<compile_context>
chip_gen: v7x
topology: tpu7x:2x2x1
jax: 0.10.0
libtpu: 0.0.40
codegen_flags: <defaults>
</compile_context>

<pallas_src>
import jax
import jax.numpy as jnp
from jax import lax
from jax.experimental import pallas as pl
from jax.experimental.pallas import tpu as pltpu

# Hyper-parameters implied by the forward pass (ntoken must be 1, ninp must equal nhid).
NTOKEN = 1
NINP = 32
NHID = 32
NLAYERS = 2
B = 8   # input.size(0)  (batch)
T = 8   # input.size(1)  (sequence length)
BT = B * T


def lstm_wavefront_kernel(x_ref, wblk_ref, cslab_ref, state_ref,
                          dec_ref, stout_ref, xg_sc):
    H = NHID
    HH = 2 * H            # packed (layer-0 | layer-1) width per gate  = 64
    # packed gate width = 4 * HH = 256

    # ---- hoisted constant loads ------------------------------------------------
    wblk = wblk_ref[...]              # (2H, 8H) block weights [[Whh0, Wih1],[0, Whh1]] (interleaved gates)
    wrow = cslab_ref[0:1, :]          # (1, 8H) encoder-folded x weight (layer-1 lanes are 0)
    brow = cslab_ref[1:2, :]          # (1, 8H) layer-0 fused bias | layer-1 bias b1
    w_dec = cslab_ref[2:3, 0:HH]      # (1, 2H) decoder weight on layer-1 lanes, 0 on layer-0 lanes
    b_dec = cslab_ref[3:4, 0:1]       # (1, 1)

    # ---- layer-0 input gates precompute (encoder folded); layer-1 lanes hold b1 -
    xg_sc[...] = x_ref[...] * wrow + brow          # (BT, 8H)
    # TODO(synk): nn.Dropout is stochastic; modeled as identity (eval/inference mode).

    l0_lane = lax.broadcasted_iota(jnp.int32, (B, HH), 1) < H     # layer-0 lanes of packed state
    t_lane = lax.broadcasted_iota(jnp.int32, (B, T), 1)           # decoded-output column index

    def superstep(h_full, c_full, row0):
        # ONE fused (B,2H)x(2H,8H) MXU matmul = layer-0 recurrent + layer-1 input + layer-1 recurrent.
        fused = jnp.dot(h_full, wblk, preferred_element_type=jnp.float32)   # (B, 8H)
        gates = fused + xg_sc[row0:row0 + B, :]
        sig = jax.nn.sigmoid(gates)                 # whole-vreg EUP pushes (i, f, o; g lanes wasted)
        g = jnp.tanh(gates[:, 2 * HH:3 * HH])       # only the g gate block through tanh
        i = sig[:, 0:HH]
        f = sig[:, HH:2 * HH]
        o = sig[:, 3 * HH:4 * HH]
        c_new = f * c_full + i * g                  # packed [c0 | c1]
        h_new = o * jnp.tanh(c_new)                 # packed [h0 | h1]
        return h_new, c_new

    def decode(h_full):
        # decoder Linear(H->1): w_dec is zero on layer-0 lanes, so this reads only h1.
        return jnp.sum(h_full * w_dec, axis=-1, keepdims=True) + b_dec      # (B, 1)

    h_full = state_ref[0]             # (B, 2H) = [h0_init | h1_init]
    c_full = state_ref[1]             # (B, 2H) = [c0_init | c1_init]
    dec_acc = jnp.zeros((B, T), jnp.float32)

    # ---- superstep 0: layer-0 step 0 only (layer-1 half of the update discarded) -
    hn, cn = superstep(h_full, c_full, 0)
    h_full = jnp.where(l0_lane, hn, h_full)
    c_full = jnp.where(l0_lane, cn, c_full)

    # ---- steady supersteps s = 1..T-1: layer-0 step s + layer-1 step s-1 ---------
    for s in range(1, T):
        h_full, c_full = superstep(h_full, c_full, s * B)
        dec_acc = jnp.where(t_lane == (s - 1), decode(h_full), dec_acc)

    # ---- superstep T: layer-1 step T-1 only (layer-0 half discarded) -------------
    hn, cn = superstep(h_full, c_full, 0)   # row 0 reused: its layer-1 lanes are the constant b1
    h_full = jnp.where(l0_lane, h_full, hn)
    c_full = jnp.where(l0_lane, c_full, cn)
    dec_acc = jnp.where(t_lane == (T - 1), decode(h_full), dec_acc)

    # ---- single epilogue stores (no per-step masked stores in the hot loop) ------
    dec_ref[...] = dec_acc            # (B, T); transposed/reshaped to (T, B, 1) in the wrapper
    stout_ref[0] = h_full             # [h0_n | h1_n]
    stout_ref[1] = c_full             # [c0_n | c1_n]


def rnn_model_forward(x, kparams, hidden):
    """x: (B, T) f32, hidden: (h0, c0) each (NLAYERS, B, NHID)."""
    h0, c0 = hidden
    x_flat = x.reshape(BT, 1)                              # == input.contiguous().view(B*T, 1)
    state_in = jnp.stack([
        jnp.concatenate([h0[0], h0[1]], axis=1),           # (B, 2H) packed [layer0 | layer1]
        jnp.concatenate([c0[0], c0[1]], axis=1),
    ], axis=0)                                             # (2, B, 2H)

    vmem = pl.BlockSpec(memory_space=pltpu.MemorySpace.VMEM)
    out_shapes = (
        jax.ShapeDtypeStruct((B, T), jnp.float32),                 # decoded, column t = time step t
        jax.ShapeDtypeStruct((2, B, 2 * NHID), jnp.float32),       # packed [h_n; c_n]
    )
    dec_bt, state_out = pl.pallas_call(
        lstm_wavefront_kernel,
        out_shape=out_shapes,
        in_specs=[vmem] * 4,
        out_specs=(vmem, vmem),
        scratch_shapes=[
            pltpu.VMEM((BT, 8 * NHID), jnp.float32),   # precomputed packed input-gate rows
        ],
    )(x_flat, kparams['wblk'], kparams['cslab'], state_in)

    decoded = dec_bt.T.reshape(T, B, NTOKEN)               # == decoded.view(T, B, ntoken)
    hn = jnp.stack([state_out[0][:, :NHID], state_out[0][:, NHID:]], axis=0)
    cn = jnp.stack([state_out[1][:, :NHID], state_out[1][:, NHID:]], axis=0)
    return decoded, (hn, cn)


def init_raw_params(key):
    """Deterministic init mirroring the module's __init__ / init_weights (PyTorch shapes)."""
    ks = jax.random.split(key, 12)
    u = lambda k, shape, r: jax.random.uniform(k, shape, jnp.float32, -r, r)
    initrange = 0.1
    stdv = float(1.0 / (NHID ** 0.5))
    return {
        'w_enc': u(ks[0], (NINP, NTOKEN), initrange),     # encoder.weight (ninp, ntoken)
        'b_enc': u(ks[1], (NINP,), 1.0),                  # encoder.bias
        'w_ih0': u(ks[2], (4 * NHID, NINP), stdv),
        'w_hh0': u(ks[3], (4 * NHID, NHID), stdv),
        'b_ih0': u(ks[4], (4 * NHID,), stdv),
        'b_hh0': u(ks[5], (4 * NHID,), stdv),
        'w_ih1': u(ks[6], (4 * NHID, NHID), stdv),
        'w_hh1': u(ks[7], (4 * NHID, NHID), stdv),
        'b_ih1': u(ks[8], (4 * NHID,), stdv),
        'b_hh1': u(ks[9], (4 * NHID,), stdv),
        'w_dec': u(ks[10], (NTOKEN, NHID), initrange),    # decoder.weight (ntoken, nhid)
        'b_dec': jnp.zeros((NTOKEN,), jnp.float32),       # decoder.bias = 0
    }


def _interleave_gates(a0, a1):
    """(n,4H),(n,4H) -> (n,8H) with column layout [i0 i1 | f0 f1 | g0 g1 | o0 o1]."""
    n = a0.shape[0]
    return jnp.stack([a0.reshape(n, 4, NHID), a1.reshape(n, 4, NHID)],
                     axis=2).reshape(n, 8 * NHID)


def pack_params(raw):
    """Pack raw PyTorch-shaped params into the kernel's fused / block-structured slabs."""
    H = NHID
    wih0T = raw['w_ih0'].T          # (NINP, 4H)
    whh0T = raw['w_hh0'].T          # (H, 4H)
    wih1T = raw['w_ih1'].T          # (H, 4H)
    whh1T = raw['w_hh1'].T          # (H, 4H)

    # Encoder (rank-1 Linear(1->H)) folded into layer-0 input-gate precompute.
    w_fused = raw['w_enc'].T @ wih0T                                        # (1, 4H)
    b_fused = (raw['b_enc'].reshape(1, NINP) @ wih0T
               + (raw['b_ih0'] + raw['b_hh0']).reshape(1, 4 * H))           # (1, 4H)
    b1 = (raw['b_ih1'] + raw['b_hh1']).reshape(1, 4 * H)                    # (1, 4H)

    # Block weight slab for the fused per-superstep matmul: [h0 | h1] @ [[Whh0, Wih1],[0, Whh1]].
    wblk = jnp.concatenate([
        _interleave_gates(whh0T, wih1T),                      # rows multiplying h0 lanes
        _interleave_gates(jnp.zeros_like(whh1T), whh1T),      # rows multiplying h1 lanes
    ], axis=0)                                                # (2H, 8H)

    wrow = _interleave_gates(w_fused, jnp.zeros_like(w_fused))   # (1, 8H)
    brow = _interleave_gates(b_fused, b1)                        # (1, 8H)
    wdec_row = jnp.zeros((1, 8 * H), jnp.float32).at[0, H:2 * H].set(raw['w_dec'][0])
    bdec_row = jnp.full((1, 8 * H), raw['b_dec'][0], jnp.float32)
    cslab = jnp.concatenate([wrow, brow, wdec_row, bdec_row], axis=0)        # (4, 8H)
    return {'wblk': wblk, 'cslab': cslab}


def reference_forward(x, raw, hidden):
    """Pure-JAX reference with the original (un-fused) module math."""
    h0, c0 = hidden
    x_flat = x.reshape(BT, 1)
    seq = x_flat @ raw['w_enc'].T + raw['b_enc']            # encoder
    layers = [(raw['w_ih0'], raw['w_hh0'], raw['b_ih0'], raw['b_hh0']),
              (raw['w_ih1'], raw['w_hh1'], raw['b_ih1'], raw['b_hh1'])]
    hs, cs = [], []
    for l, (wih, whh, bih, bhh) in enumerate(layers):
        h, c = h0[l], c0[l]
        outs = []
        for t in range(T):
            x_t = seq[t * B:(t + 1) * B]
            gates = x_t @ wih.T + h @ whh.T + bih + bhh
            i = jax.nn.sigmoid(gates[:, :NHID])
            f = jax.nn.sigmoid(gates[:, NHID:2 * NHID])
            g = jnp.tanh(gates[:, 2 * NHID:3 * NHID])
            o = jax.nn.sigmoid(gates[:, 3 * NHID:])
            c = f * c + i * g
            h = o * jnp.tanh(c)
            outs.append(h)
        seq = jnp.concatenate(outs, axis=0)
        hs.append(h)
        cs.append(c)
    dec = seq @ raw['w_dec'].T + raw['b_dec']               # decoder
    return dec.reshape(T, B, NTOKEN), (jnp.stack(hs), jnp.stack(cs))


if __name__ == "__main__":
    key = jax.random.PRNGKey(0)
    k_x, k_p, k_h, k_c = jax.random.split(key, 4)

    x = jax.random.normal(k_x, (B, T), jnp.float32)
    raw = init_raw_params(k_p)
    kparams = pack_params(raw)
    # Non-zero hidden (the module accepts arbitrary carried state; init_hidden gives zeros).
    hidden = (0.1 * jax.random.normal(k_h, (NLAYERS, B, NHID), jnp.float32),
              0.1 * jax.random.normal(k_c, (NLAYERS, B, NHID), jnp.float32))

    decoded, (hn, cn) = rnn_model_forward(x, kparams, hidden)
    jax.block_until_ready((decoded, hn, cn))

    ref_dec, (ref_hn, ref_cn) = reference_forward(x, raw, hidden)
    assert decoded.shape == (T, B, NTOKEN)
    assert hn.shape == (NLAYERS, B, NHID) and cn.shape == (NLAYERS, B, NHID)
    assert jnp.allclose(decoded, ref_dec, atol=1e-4, rtol=1e-4)
    assert jnp.allclose(hn, ref_hn, atol=1e-4, rtol=1e-4)
    assert jnp.allclose(cn, ref_cn, atol=1e-4, rtol=1e-4)

    print("KERNEL_OK")
</pallas_src>

<mosaic_0001>
module attributes {stable_mosaic.version = 11 : i64} {
  func.func @lstm_wavefront_kernel(%arg0: memref<64x1xf32, #tpu.memory_space<vmem>>, %arg1: memref<64x256xf32, #tpu.memory_space<vmem>>, %arg2: memref<4x256xf32, #tpu.memory_space<vmem>>, %arg3: memref<2x8x64xf32, #tpu.memory_space<vmem>>, %arg4: memref<8x8xf32, #tpu.memory_space<vmem>>, %arg5: memref<2x8x64xf32, #tpu.memory_space<vmem>>, %arg6: memref<64x256xf32, #tpu.memory_space<vmem>>) attributes {dimension_semantics = [], scalar_prefetch = 0 : i64, scratch_operands = 1 : i64, tpu.core_type = #tpu.core_type<tc>} {
    %c0 = arith.constant 0 : index
    %c0_0 = arith.constant 0 : index
    %0 = vector.load %arg1[%c0, %c0_0] : memref<64x256xf32, #tpu.memory_space<vmem>>, vector<64x256xf32>
    %c0_1 = arith.constant 0 : index
    %c0_2 = arith.constant 0 : index
    %1 = vector.load %arg2[%c0_1, %c0_2] : memref<4x256xf32, #tpu.memory_space<vmem>>, vector<1x256xf32>
    %c1 = arith.constant 1 : index
    %c0_3 = arith.constant 0 : index
    %2 = vector.load %arg2[%c1, %c0_3] : memref<4x256xf32, #tpu.memory_space<vmem>>, vector<1x256xf32>
    %c2 = arith.constant 2 : index
    %c0_4 = arith.constant 0 : index
    %3 = vector.load %arg2[%c2, %c0_4] : memref<4x256xf32, #tpu.memory_space<vmem>>, vector<1x64xf32>
    %c3 = arith.constant 3 : index
    %c0_5 = arith.constant 0 : index
    %4 = vector.load %arg2[%c3, %c0_5] : memref<4x256xf32, #tpu.memory_space<vmem>>, vector<1x1xf32>
    %c0_6 = arith.constant 0 : index
    %c0_7 = arith.constant 0 : index
    %5 = vector.load %arg0[%c0_6, %c0_7] : memref<64x1xf32, #tpu.memory_space<vmem>>, vector<64x1xf32>
    %6 = vector.broadcast %5 : vector<64x1xf32> to vector<64x256xf32>
    %7 = vector.broadcast %1 : vector<1x256xf32> to vector<64x256xf32>
    %8 = arith.mulf %6, %7 : vector<64x256xf32>
    %9 = vector.broadcast %2 : vector<1x256xf32> to vector<64x256xf32>
    %10 = arith.addf %8, %9 : vector<64x256xf32>
    %c0_8 = arith.constant 0 : index
    %c0_9 = arith.constant 0 : index
    %11 = vector.load %arg6[%c0_8, %c0_9] : memref<64x256xf32, #tpu.memory_space<vmem>>, vector<64x256xf32>
    tpu.vector_store %arg6[%c0_8, %c0_9], %10 {strides = array<i32>} : memref<64x256xf32, #tpu.memory_space<vmem>>, vector<64x256xf32>,
    %12 = tpu.iota {dimensions = array<i32: 1>} : vector<8x64xi32>
    %c32_i32 = arith.constant 32 : i32
    %13 = vector.broadcast %c32_i32 : i32 to vector<8x64xi32>
    %14 = arith.cmpi slt, %12, %13 : vector<8x64xi32>
    %15 = tpu.iota {dimensions = array<i32: 1>} : vector<8x8xi32>
    %c0_10 = arith.constant 0 : index
    %c0_11 = arith.constant 0 : index
    %c0_12 = arith.constant 0 : index
    %16 = vector.load %arg3[%c0_10, %c0_11, %c0_12] : memref<2x8x64xf32, #tpu.memory_space<vmem>>, vector<1x8x64xf32>
    %17 = vector.shape_cast %16 : vector<1x8x64xf32> to vector<8x64xf32>
    %c1_13 = arith.constant 1 : index
    %c0_14 = arith.constant 0 : index
    %c0_15 = arith.constant 0 : index
    %18 = vector.load %arg3[%c1_13, %c0_14, %c0_15] : memref<2x8x64xf32, #tpu.memory_space<vmem>>, vector<1x8x64xf32>
    %19 = vector.shape_cast %18 : vector<1x8x64xf32> to vector<8x64xf32>
    %cst = arith.constant 0.000000e+00 : f32
    %20 = vector.broadcast %cst : f32 to vector<8x8xf32>
    %cst_16 = arith.constant dense<0.000000e+00> : vector<8x256xf32>
    %21 = tpu.matmul %17, %0, %cst_16 {dimension_numbers = #tpu.dot_dimension_numbers<[1], [0], [0], [1], [0, 0, 1, 1], [], []>} : vector<8x64xf32>, vector<64x256xf32>, vector<8x256xf32> -> vector<8x256xf32>
    %c0_17 = arith.constant 0 : index
    %c0_18 = arith.constant 0 : index
    %22 = vector.load %arg6[%c0_17, %c0_18] : memref<64x256xf32, #tpu.memory_space<vmem>>, vector<8x256xf32>
    %23 = arith.addf %21, %22 : vector<8x256xf32>
    %24 = arith.negf %23 : vector<8x256xf32>
    %25 = math.exp %24 : vector<8x256xf32>
    %cst_19 = arith.constant 1.000000e+00 : f32
    %26 = vector.broadcast %cst_19 : f32 to vector<8x256xf32>
    %27 = arith.addf %26, %25 : vector<8x256xf32>
    %28 = arith.divf %26, %27 : vector<8x256xf32>
    %29 = vector.extract_strided_slice %23 {offsets = [0, 128], sizes = [8, 64], strides = [1, 1]} : vector<8x256xf32> to vector<8x64xf32>
    %30 = math.tanh %29 : vector<8x64xf32>
    %31 = vector.extract_strided_slice %28 {offsets = [0, 0], sizes = [8, 64], strides = [1, 1]} : vector<8x256xf32> to vector<8x64xf32>
    %32 = vector.extract_strided_slice %28 {offsets = [0, 64], sizes = [8, 64], strides = [1, 1]} : vector<8x256xf32> to vector<8x64xf32>
    %33 = vector.extract_strided_slice %28 {offsets = [0, 192], sizes = [8, 64], strides = [1, 1]} : vector<8x256xf32> to vector<8x64xf32>
    %34 = arith.mulf %32, %19 : vector<8x64xf32>
    %35 = arith.mulf %31, %30 : vector<8x64xf32>
    %36 = arith.addf %34, %35 : vector<8x64xf32>
    %37 = math.tanh %36 : vector<8x64xf32>
    %38 = arith.mulf %33, %37 : vector<8x64xf32>
    %39 = arith.select %14, %38, %17 : vector<8x64xi1>, vector<8x64xf32>
    %40 = arith.select %14, %36, %19 : vector<8x64xi1>, vector<8x64xf32>
    %cst_20 = arith.constant dense<0.000000e+00> : vector<8x256xf32>
    %41 = tpu.matmul %39, %0, %cst_20 {dimension_numbers = #tpu.dot_dimension_numbers<[1], [0], [0], [1], [0, 0, 1, 1], [], []>} : vector<8x64xf32>, vector<64x256xf32>, vector<8x256xf32> -> vector<8x256xf32>
    %c8 = arith.constant 8 : index
    %c0_21 = arith.constant 0 : index
    %42 = vector.load %arg6[%c8, %c0_21] : memref<64x256xf32, #tpu.memory_space<vmem>>, vector<8x256xf32>
    %43 = arith.addf %41, %42 : vector<8x256xf32>
    %44 = arith.negf %43 : vector<8x256xf32>
    %45 = math.exp %44 : vector<8x256xf32>
    %cst_22 = arith.constant 1.000000e+00 : f32
    %46 = vector.broadcast %cst_22 : f32 to vector<8x256xf32>
    %47 = arith.addf %46, %45 : vector<8x256xf32>
    %48 = arith.divf %46, %47 : vector<8x256xf32>
    %49 = vector.extract_strided_slice %43 {offsets = [0, 128], sizes = [8, 64], strides = [1, 1]} : vector<8x256xf32> to vector<8x64xf32>
    %50 = math.tanh %49 : vector<8x64xf32>
    %51 = vector.extract_strided_slice %48 {offsets = [0, 0], sizes = [8, 64], strides = [1, 1]} : vector<8x256xf32> to vector<8x64xf32>
    %52 = vector.extract_strided_slice %48 {offsets = [0, 64], sizes = [8, 64], strides = [1, 1]} : vector<8x256xf32> to vector<8x64xf32>
    %53 = vector.extract_strided_slice %48 {offsets = [0, 192], sizes = [8, 64], strides = [1, 1]} : vector<8x256xf32> to vector<8x64xf32>
    %54 = arith.mulf %52, %40 : vector<8x64xf32>
    %55 = arith.mulf %51, %50 : vector<8x64xf32>
    %56 = arith.addf %54, %55 : vector<8x64xf32>
    %57 = math.tanh %56 : vector<8x64xf32>
    %58 = arith.mulf %53, %57 : vector<8x64xf32>
    %c0_i32 = arith.constant 0 : i32
    %59 = vector.broadcast %c0_i32 : i32 to vector<8x8xi32>
    %60 = arith.cmpi eq, %15, %59 : vector<8x8xi32>
    %61 = vector.broadcast %3 : vector<1x64xf32> to vector<8x64xf32>
    %62 = arith.mulf %58, %61 : vector<8x64xf32>
    %cst_23 = arith.constant dense<0.000000e+00> : vector<8xf32>
    %63 = vector.multi_reduction <add>, %62, %cst_23 [1] : vector<8x64xf32> to vector<8xf32>
    %64 = vector.shape_cast %63 : vector<8xf32> to vector<8x1xf32>
    %65 = vector.broadcast %4 : vector<1x1xf32> to vector<8x1xf32>
    %66 = arith.addf %64, %65 : vector<8x1xf32>
    %67 = vector.shape_cast %66 : vector<8x1xf32> to vector<8x1xf32>
    %68 = vector.broadcast %67 : vector<8x1xf32> to vector<8x8xf32>
    %69 = arith.select %60, %68, %20 : vector<8x8xi1>, vector<8x8xf32>
    %cst_24 = arith.constant dense<0.000000e+00> : vector<8x256xf32>
    %70 = tpu.matmul %58, %0, %cst_24 {dimension_numbers = #tpu.dot_dimension_numbers<[1], [0], [0], [1], [0, 0, 1, 1], [], []>} : vector<8x64xf32>, vector<64x256xf32>, vector<8x256xf32> -> vector<8x256xf32>
    %c16 = arith.constant 16 : index
    %c0_25 = arith.constant 0 : index
    %71 = vector.load %arg6[%c16, %c0_25] : memref<64x256xf32, #tpu.memory_space<vmem>>, vector<8x256xf32>
    %72 = arith.addf %70, %71 : vector<8x256xf32>
    %73 = arith.negf %72 : vector<8x256xf32>
    %74 = math.exp %73 : vector<8x256xf32>
    %cst_26 = arith.constant 1.000000e+00 : f32
    %75 = vector.broadcast %cst_26 : f32 to vector<8x256xf32>
    %76 = arith.addf %75, %74 : vector<8x256xf32>
    %77 = arith.divf %75, %76 : vector<8x256xf32>
    %78 = vector.extract_strided_slice %72 {offsets = [0, 128], sizes = [8, 64], strides = [1, 1]} : vector<8x256xf32> to vector<8x64xf32>
    %79 = math.tanh %78 : vector<8x64xf32>
    %80 = vector.extract_strided_slice %77 {offsets = [0, 0], sizes = [8, 64], strides = [1, 1]} : vector<8x256xf32> to vector<8x64xf32>
    %81 = vector.extract_strided_slice %77 {offsets = [0, 64], sizes = [8, 64], strides = [1, 1]} : vector<8x256xf32> to vector<8x64xf32>
    %82 = vector.extract_strided_slice %77 {offsets = [0, 192], sizes = [8, 64], strides = [1, 1]} : vector<8x256xf32> to vector<8x64xf32>
    %83 = arith.mulf %81, %56 : vector<8x64xf32>
    %84 = arith.mulf %80, %79 : vector<8x64xf32>
    %85 = arith.addf %83, %84 : vector<8x64xf32>
    %86 = math.tanh %85 : vector<8x64xf32>
    %87 = arith.mulf %82, %86 : vector<8x64xf32>
    %c1_i32 = arith.constant 1 : i32
    %88 = vector.broadcast %c1_i32 : i32 to vector<8x8xi32>
    %89 = arith.cmpi eq, %15, %88 : vector<8x8xi32>
    %90 = vector.broadcast %3 : vector<1x64xf32> to vector<8x64xf32>
    %91 = arith.mulf %87, %90 : vector<8x64xf32>
    %cst_27 = arith.constant dense<0.000000e+00> : vector<8xf32>
    %92 = vector.multi_reduction <add>, %91, %cst_27 [1] : vector<8x64xf32> to vector<8xf32>
    %93 = vector.shape_cast %92 : vector<8xf32> to vector<8x1xf32>
    %94 = vector.broadcast %4 : vector<1x1xf32> to vector<8x1xf32>
    %95 = arith.addf %93, %94 : vector<8x1xf32>
    %96 = vector.shape_cast %95 : vector<8x1xf32> to vector<8x1xf32>
    %97 = vector.broadcast %96 : vector<8x1xf32> to vector<8x8xf32>
    %98 = arith.select %89, %97, %69 : vector<8x8xi1>, vector<8x8xf32>
    %cst_28 = arith.constant dense<0.000000e+00> : vector<8x256xf32>
    %99 = tpu.matmul %87, %0, %cst_28 {dimension_numbers = #tpu.dot_dimension_numbers<[1], [0], [0], [1], [0, 0, 1, 1], [], []>} : vector<8x64xf32>, vector<64x256xf32>, vector<8x256xf32> -> vector<8x256xf32>
    %c24 = arith.constant 24 : index
    %c0_29 = arith.constant 0 : index
    %100 = vector.load %arg6[%c24, %c0_29] : memref<64x256xf32, #tpu.memory_space<vmem>>, vector<8x256xf32>
    %101 = arith.addf %99, %100 : vector<8x256xf32>
    %102 = arith.negf %101 : vector<8x256xf32>
    %103 = math.exp %102 : vector<8x256xf32>
    %cst_30 = arith.constant 1.000000e+00 : f32
    %104 = vector.broadcast %cst_30 : f32 to vector<8x256xf32>
    %105 = arith.addf %104, %103 : vector<8x256xf32>
    %106 = arith.divf %104, %105 : vector<8x256xf32>
    %107 = vector.extract_strided_slice %101 {offsets = [0, 128], sizes = [8, 64], strides = [1, 1]} : vector<8x256xf32> to vector<8x64xf32>
    %108 = math.tanh %107 : vector<8x64xf32>
    %109 = vector.extract_strided_slice %106 {offsets = [0, 0], sizes = [8, 64], strides = [1, 1]} : vector<8x256xf32> to vector<8x64xf32>
    %110 = vector.extract_strided_slice %106 {offsets = [0, 64], sizes = [8, 64], strides = [1, 1]} : vector<8x256xf32> to vector<8x64xf32>
    %111 = vector.extract_strided_slice %106 {offsets = [0, 192], sizes = [8, 64], strides = [1, 1]} : vector<8x256xf32> to vector<8x64xf32>
    %112 = arith.mulf %110, %85 : vector<8x64xf32>
    %113 = arith.mulf %109, %108 : vector<8x64xf32>
    %114 = arith.addf %112, %113 : vector<8x64xf32>
    %115 = math.tanh %114 : vector<8x64xf32>
    %116 = arith.mulf %111, %115 : vector<8x64xf32>
    %c2_i32 = arith.constant 2 : i32
    %117 = vector.broadcast %c2_i32 : i32 to vector<8x8xi32>
    %118 = arith.cmpi eq, %15, %117 : vector<8x8xi32>
    %119 = vector.broadcast %3 : vector<1x64xf32> to vector<8x64xf32>
    %120 = arith.mulf %116, %119 : vector<8x64xf32>
    %cst_31 = arith.constant dense<0.000000e+00> : vector<8xf32>
    %121 = vector.multi_reduction <add>, %120, %cst_31 [1] : vector<8x64xf32> to vector<8xf32>
    %122 = vector.shape_cast %121 : vector<8xf32> to vector<8x1xf32>
    %123 = vector.broadcast %4 : vector<1x1xf32> to vector<8x1xf32>
    %124 = arith.addf %122, %123 : vector<8x1xf32>
    %125 = vector.shape_cast %124 : vector<8x1xf32> to vector<8x1xf32>
    %126 = vector.broadcast %125 : vector<8x1xf32> to vector<8x8xf32>
    %127 = arith.select %118, %126, %98 : vector<8x8xi1>, vector<8x8xf32>
    %cst_32 = arith.constant dense<0.000000e+00> : vector<8x256xf32>
    %128 = tpu.matmul %116, %0, %cst_32 {dimension_numbers = #tpu.dot_dimension_numbers<[1], [0], [0], [1], [0, 0, 1, 1], [], []>} : vector<8x64xf32>, vector<64x256xf32>, vector<8x256xf32> -> vector<8x256xf32>
    %c32 = arith.constant 32 : index
    %c0_33 = arith.constant 0 : index
    %129 = vector.load %arg6[%c32, %c0_33] : memref<64x256xf32, #tpu.memory_space<vmem>>, vector<8x256xf32>
    %130 = arith.addf %128, %129 : vector<8x256xf32>
    %131 = arith.negf %130 : vector<8x256xf32>
    %132 = math.exp %131 : vector<8x256xf32>
    %cst_34 = arith.constant 1.000000e+00 : f32
    %133 = vector.broadcast %cst_34 : f32 to vector<8x256xf32>
    %134 = arith.addf %133, %132 : vector<8x256xf32>
    %135 = arith.divf %133, %134 : vector<8x256xf32>
    %136 = vector.extract_strided_slice %130 {offsets = [0, 128], sizes = [8, 64], strides = [1, 1]} : vector<8x256xf32> to vector<8x64xf32>
    %137 = math.tanh %136 : vector<8x64xf32>
    %138 = vector.extract_strided_slice %135 {offsets = [0, 0], sizes = [8, 64], strides = [1, 1]} : vector<8x256xf32> to vector<8x64xf32>
    %139 = vector.extract_strided_slice %135 {offsets = [0, 64], sizes = [8, 64], strides = [1, 1]} : vector<8x256xf32> to vector<8x64xf32>
    %140 = vector.extract_strided_slice %135 {offsets = [0, 192], sizes = [8, 64], strides = [1, 1]} : vector<8x256xf32> to vector<8x64xf32>
    %141 = arith.mulf %139, %114 : vector<8x64xf32>
    %142 = arith.mulf %138, %137 : vector<8x64xf32>
    %143 = arith.addf %141, %142 : vector<8x64xf32>
    %144 = math.tanh %143 : vector<8x64xf32>
    %145 = arith.mulf %140, %144 : vector<8x64xf32>
    %c3_i32 = arith.constant 3 : i32
    %146 = vector.broadcast %c3_i32 : i32 to vector<8x8xi32>
    %147 = arith.cmpi eq, %15, %146 : vector<8x8xi32>
    %148 = vector.broadcast %3 : vector<1x64xf32> to vector<8x64xf32>
    %149 = arith.mulf %145, %148 : vector<8x64xf32>
    %cst_35 = arith.constant dense<0.000000e+00> : vector<8xf32>
    %150 = vector.multi_reduction <add>, %149, %cst_35 [1] : vector<8x64xf32> to vector<8xf32>
    %151 = vector.shape_cast %150 : vector<8xf32> to vector<8x1xf32>
    %152 = vector.broadcast %4 : vector<1x1xf32> to vector<8x1xf32>
    %153 = arith.addf %151, %152 : vector<8x1xf32>
    %154 = vector.shape_cast %153 : vector<8x1xf32> to vector<8x1xf32>
    %155 = vector.broadcast %154 : vector<8x1xf32> to vector<8x8xf32>
    %156 = arith.select %147, %155, %127 : vector<8x8xi1>, vector<8x8xf32>
    %cst_36 = arith.constant dense<0.000000e+00> : vector<8x256xf32>
    %157 = tpu.matmul %145, %0, %cst_36 {dimension_numbers = #tpu.dot_dimension_numbers<[1], [0], [0], [1], [0, 0, 1, 1], [], []>} : vector<8x64xf32>, vector<64x256xf32>, vector<8x256xf32> -> vector<8x256xf32>
    %c40 = arith.constant 40 : index
    %c0_37 = arith.constant 0 : index
    %158 = vector.load %arg6[%c40, %c0_37] : memref<64x256xf32, #tpu.memory_space<vmem>>, vector<8x256xf32>
    %159 = arith.addf %157, %158 : vector<8x256xf32>
    %160 = arith.negf %159 : vector<8x256xf32>
    %161 = math.exp %160 : vector<8x256xf32>
    %cst_38 = arith.constant 1.000000e+00 : f32
    %162 = vector.broadcast %cst_38 : f32 to vector<8x256xf32>
    %163 = arith.addf %162, %161 : vector<8x256xf32>
    %164 = arith.divf %162, %163 : vector<8x256xf32>
    %165 = vector.extract_strided_slice %159 {offsets = [0, 128], sizes = [8, 64], strides = [1, 1]} : vector<8x256xf32> to vector<8x64xf32>
    %166 = math.tanh %165 : vector<8x64xf32>
    %167 = vector.extract_strided_slice %164 {offsets = [0, 0], sizes = [8, 64], strides = [1, 1]} : vector<8x256xf32> to vector<8x64xf32>
    %168 = vector.extract_strided_slice %164 {offsets = [0, 64], sizes = [8, 64], strides = [1, 1]} : vector<8x256xf32> to vector<8x64xf32>
    %169 = vector.extract_strided_slice %164 {offsets = [0, 192], sizes = [8, 64], strides = [1, 1]} : vector<8x256xf32> to vector<8x64xf32>
    %170 = arith.mulf %168, %143 : vector<8x64xf32>
    %171 = arith.mulf %167, %166 : vector<8x64xf32>
    %172 = arith.addf %170, %171 : vector<8x64xf32>
    %173 = math.tanh %172 : vector<8x64xf32>
    %174 = arith.mulf %169, %173 : vector<8x64xf32>
    %c4_i32 = arith.constant 4 : i32
    %175 = vector.broadcast %c4_i32 : i32 to vector<8x8xi32>
    %176 = arith.cmpi eq, %15, %175 : vector<8x8xi32>
    %177 = vector.broadcast %3 : vector<1x64xf32> to vector<8x64xf32>
    %178 = arith.mulf %174, %177 : vector<8x64xf32>
    %cst_39 = arith.constant dense<0.000000e+00> : vector<8xf32>
    %179 = vector.multi_reduction <add>, %178, %cst_39 [1] : vector<8x64xf32> to vector<8xf32>
    %180 = vector.shape_cast %179 : vector<8xf32> to vector<8x1xf32>
    %181 = vector.broadcast %4 : vector<1x1xf32> to vector<8x1xf32>
    %182 = arith.addf %180, %181 : vector<8x1xf32>
    %183 = vector.shape_cast %182 : vector<8x1xf32> to vector<8x1xf32>
    %184 = vector.broadcast %183 : vector<8x1xf32> to vector<8x8xf32>
    %185 = arith.select %176, %184, %156 : vector<8x8xi1>, vector<8x8xf32>
    %cst_40 = arith.constant dense<0.000000e+00> : vector<8x256xf32>
    %186 = tpu.matmul %174, %0, %cst_40 {dimension_numbers = #tpu.dot_dimension_numbers<[1], [0], [0], [1], [0, 0, 1, 1], [], []>} : vector<8x64xf32>, vector<64x256xf32>, vector<8x256xf32> -> vector<8x256xf32>
    %c48 = arith.constant 48 : index
    %c0_41 = arith.constant 0 : index
    %187 = vector.load %arg6[%c48, %c0_41] : memref<64x256xf32, #tpu.memory_space<vmem>>, vector<8x256xf32>
    %188 = arith.addf %186, %187 : vector<8x256xf32>
    %189 = arith.negf %188 : vector<8x256xf32>
    %190 = math.exp %189 : vector<8x256xf32>
    %cst_42 = arith.constant 1.000000e+00 : f32
    %191 = vector.broadcast %cst_42 : f32 to vector<8x256xf32>
    %192 = arith.addf %191, %190 : vector<8x256xf32>
    %193 = arith.divf %191, %192 : vector<8x256xf32>
    %194 = vector.extract_strided_slice %188 {offsets = [0, 128], sizes = [8, 64], strides = [1, 1]} : vector<8x256xf32> to vector<8x64xf32>
    %195 = math.tanh %194 : vector<8x64xf32>
    %196 = vector.extract_strided_slice %193 {offsets = [0, 0], sizes = [8, 64], strides = [1, 1]} : vector<8x256xf32> to vector<8x64xf32>
    %197 = vector.extract_strided_slice %193 {offsets = [0, 64], sizes = [8, 64], strides = [1, 1]} : vector<8x256xf32> to vector<8x64xf32>
    %198 = vector.extract_strided_slice %193 {offsets = [0, 192], sizes = [8, 64], strides = [1, 1]} : vector<8x256xf32> to vector<8x64xf32>
    %199 = arith.mulf %197, %172 : vector<8x64xf32>
    %200 = arith.mulf %196, %195 : vector<8x64xf32>
    %201 = arith.addf %199, %200 : vector<8x64xf32>
    %202 = math.tanh %201 : vector<8x64xf32>
    %203 = arith.mulf %198, %202 : vector<8x64xf32>
    %c5_i32 = arith.constant 5 : i32
    %204 = vector.broadcast %c5_i32 : i32 to vector<8x8xi32>
    %205 = arith.cmpi eq, %15, %204 : vector<8x8xi32>
    %206 = vector.broadcast %3 : vector<1x64xf32> to vector<8x64xf32>
    %207 = arith.mulf %203, %206 : vector<8x64xf32>
    %cst_43 = arith.constant dense<0.000000e+00> : vector<8xf32>
    %208 = vector.multi_reduction <add>, %207, %cst_43 [1] : vector<8x64xf32> to vector<8xf32>
    %209 = vector.shape_cast %208 : vector<8xf32> to vector<8x1xf32>
    %210 = vector.broadcast %4 : vector<1x1xf32> to vector<8x1xf32>
    %211 = arith.addf %209, %210 : vector<8x1xf32>
    %212 = vector.shape_cast %211 : vector<8x1xf32> to vector<8x1xf32>
    %213 = vector.broadcast %212 : vector<8x1xf32> to vector<8x8xf32>
    %214 = arith.select %205, %213, %185 : vector<8x8xi1>, vector<8x8xf32>
    %cst_44 = arith.constant dense<0.000000e+00> : vector<8x256xf32>
    %215 = tpu.matmul %203, %0, %cst_44 {dimension_numbers = #tpu.dot_dimension_numbers<[1], [0], [0], [1], [0, 0, 1, 1], [], []>} : vector<8x64xf32>, vector<64x256xf32>, vector<8x256xf32> -> vector<8x256xf32>
    %c56 = arith.constant 56 : index
    %c0_45 = arith.constant 0 : index
    %216 = vector.load %arg6[%c56, %c0_45] : memref<64x256xf32, #tpu.memory_space<vmem>>, vector<8x256xf32>
    %217 = arith.addf %215, %216 : vector<8x256xf32>
    %218 = arith.negf %217 : vector<8x256xf32>
    %219 = math.exp %218 : vector<8x256xf32>
    %cst_46 = arith.constant 1.000000e+00 : f32
    %220 = vector.broadcast %cst_46 : f32 to vector<8x256xf32>
    %221 = arith.addf %220, %219 : vector<8x256xf32>
    %222 = arith.divf %220, %221 : vector<8x256xf32>
    %223 = vector.extract_strided_slice %217 {offsets = [0, 128], sizes = [8, 64], strides = [1, 1]} : vector<8x256xf32> to vector<8x64xf32>
    %224 = math.tanh %223 : vector<8x64xf32>
    %225 = vector.extract_strided_slice %222 {offsets = [0, 0], sizes = [8, 64], strides = [1, 1]} : vector<8x256xf32> to vector<8x64xf32>
    %226 = vector.extract_strided_slice %222 {offsets = [0, 64], sizes = [8, 64], strides = [1, 1]} : vector<8x256xf32> to vector<8x64xf32>
    %227 = vector.extract_strided_slice %222 {offsets = [0, 192], sizes = [8, 64], strides = [1, 1]} : vector<8x256xf32> to vector<8x64xf32>
    %228 = arith.mulf %226, %201 : vector<8x64xf32>
    %229 = arith.mulf %225, %224 : vector<8x64xf32>
    %230 = arith.addf %228, %229 : vector<8x64xf32>
    %231 = math.tanh %230 : vector<8x64xf32>
    %232 = arith.mulf %227, %231 : vector<8x64xf32>
    %c6_i32 = arith.constant 6 : i32
    %233 = vector.broadcast %c6_i32 : i32 to vector<8x8xi32>
    %234 = arith.cmpi eq, %15, %233 : vector<8x8xi32>
    %235 = vector.broadcast %3 : vector<1x64xf32> to vector<8x64xf32>
    %236 = arith.mulf %232, %235 : vector<8x64xf32>
    %cst_47 = arith.constant dense<0.000000e+00> : vector<8xf32>
    %237 = vector.multi_reduction <add>, %236, %cst_47 [1] : vector<8x64xf32> to vector<8xf32>
    %238 = vector.shape_cast %237 : vector<8xf32> to vector<8x1xf32>
    %239 = vector.broadcast %4 : vector<1x1xf32> to vector<8x1xf32>
    %240 = arith.addf %238, %239 : vector<8x1xf32>
    %241 = vector.shape_cast %240 : vector<8x1xf32> to vector<8x1xf32>
    %242 = vector.broadcast %241 : vector<8x1xf32> to vector<8x8xf32>
    %243 = arith.select %234, %242, %214 : vector<8x8xi1>, vector<8x8xf32>
    %cst_48 = arith.constant dense<0.000000e+00> : vector<8x256xf32>
    %244 = tpu.matmul %232, %0, %cst_48 {dimension_numbers = #tpu.dot_dimension_numbers<[1], [0], [0], [1], [0, 0, 1, 1], [], []>} : vector<8x64xf32>, vector<64x256xf32>, vector<8x256xf32> -> vector<8x256xf32>
    %c0_49 = arith.constant 0 : index
    %c0_50 = arith.constant 0 : index
    %245 = vector.load %arg6[%c0_49, %c0_50] : memref<64x256xf32, #tpu.memory_space<vmem>>, vector<8x256xf32>
    %246 = arith.addf %244, %245 : vector<8x256xf32>
    %247 = arith.negf %246 : vector<8x256xf32>
    %248 = math.exp %247 : vector<8x256xf32>
    %cst_51 = arith.constant 1.000000e+00 : f32
    %249 = vector.broadcast %cst_51 : f32 to vector<8x256xf32>
    %250 = arith.addf %249, %248 : vector<8x256xf32>
    %251 = arith.divf %249, %250 : vector<8x256xf32>
    %252 = vector.extract_strided_slice %246 {offsets = [0, 128], sizes = [8, 64], strides = [1, 1]} : vector<8x256xf32> to vector<8x64xf32>
    %253 = math.tanh %252 : vector<8x64xf32>
    %254 = vector.extract_strided_slice %251 {offsets = [0, 0], sizes = [8, 64], strides = [1, 1]} : vector<8x256xf32> to vector<8x64xf32>
    %255 = vector.extract_strided_slice %251 {offsets = [0, 64], sizes = [8, 64], strides = [1, 1]} : vector<8x256xf32> to vector<8x64xf32>
    %256 = vector.extract_strided_slice %251 {offsets = [0, 192], sizes = [8, 64], strides = [1, 1]} : vector<8x256xf32> to vector<8x64xf32>
    %257 = arith.mulf %255, %230 : vector<8x64xf32>
    %258 = arith.mulf %254, %253 : vector<8x64xf32>
    %259 = arith.addf %257, %258 : vector<8x64xf32>
    %260 = math.tanh %259 : vector<8x64xf32>
    %261 = arith.mulf %256, %260 : vector<8x64xf32>
    %262 = arith.select %14, %232, %261 : vector<8x64xi1>, vector<8x64xf32>
    %263 = arith.select %14, %230, %259 : vector<8x64xi1>, vector<8x64xf32>
    %c7_i32 = arith.constant 7 : i32
    %264 = vector.broadcast %c7_i32 : i32 to vector<8x8xi32>
    %265 = arith.cmpi eq, %15, %264 : vector<8x8xi32>
    %266 = vector.broadcast %3 : vector<1x64xf32> to vector<8x64xf32>
    %267 = arith.mulf %262, %266 : vector<8x64xf32>
    %cst_52 = arith.constant dense<0.000000e+00> : vector<8xf32>
    %268 = vector.multi_reduction <add>, %267, %cst_52 [1] : vector<8x64xf32> to vector<8xf32>
    %269 = vector.shape_cast %268 : vector<8xf32> to vector<8x1xf32>
    %270 = vector.broadcast %4 : vector<1x1xf32> to vector<8x1xf32>
    %271 = arith.addf %269, %270 : vector<8x1xf32>
    %272 = vector.shape_cast %271 : vector<8x1xf32> to vector<8x1xf32>
    %273 = vector.broadcast %272 : vector<8x1xf32> to vector<8x8xf32>
    %274 = arith.select %265, %273, %243 : vector<8x8xi1>, vector<8x8xf32>
    %c0_53 = arith.constant 0 : index
    %c0_54 = arith.constant 0 : index
    %275 = vector.load %arg4[%c0_53, %c0_54] : memref<8x8xf32, #tpu.memory_space<vmem>>, vector<8x8xf32>
    tpu.vector_store %arg4[%c0_53, %c0_54], %274 {strides = array<i32>} : memref<8x8xf32, #tpu.memory_space<vmem>>, vector<8x8xf32>,
    %c0_55 = arith.constant 0 : index
    %c0_56 = arith.constant 0 : index
    %c0_57 = arith.constant 0 : index
    %276 = vector.load %arg5[%c0_55, %c0_56, %c0_57] : memref<2x8x64xf32, #tpu.memory_space<vmem>>, vector<1x8x64xf32>
    %277 = vector.shape_cast %276 : vector<1x8x64xf32> to vector<8x64xf32>
    %278 = vector.shape_cast %262 : vector<8x64xf32> to vector<1x8x64xf32>
    tpu.vector_store %arg5[%c0_55, %c0_56, %c0_57], %278 {strides = array<i32>} : memref<2x8x64xf32, #tpu.memory_space<vmem>>, vector<1x8x64xf32>,
    %c1_58 = arith.constant 1 : index
    %c0_59 = arith.constant 0 : index
    %c0_60 = arith.constant 0 : index
    %279 = vector.load %arg5[%c1_58, %c0_59, %c0_60] : memref<2x8x64xf32, #tpu.memory_space<vmem>>, vector<1x8x64xf32>
    %280 = vector.shape_cast %279 : vector<1x8x64xf32> to vector<8x64xf32>
    %281 = vector.shape_cast %263 : vector<8x64xf32> to vector<1x8x64xf32>
    tpu.vector_store %arg5[%c1_58, %c0_59, %c0_60], %281 {strides = array<i32>} : memref<2x8x64xf32, #tpu.memory_space<vmem>>, vector<1x8x64xf32>,
    return
  }
}

</mosaic_0001>

<bundles_post_ra>
// kernel: tpu_custom_call.1
= control target key start
LH: loop header
LB: loop body
LE: loop exit
PB: predicated region body
PF: predicated region fallthrough
CT: control target
= control target key end

     0   :  { %11 = vsyncpa [#allocation4], 0  ;;  %s2030_s0 = inlined_call_operand.vmem [shape: f32[64,1], index: 0, kind: input, shape index: {}]   ;;  %s2031_s1 = inlined_call_operand.hbm [shape: f32[64,256], index: 1, kind: input, shape index: {}]   ;;  %s2032_s2 = inlined_call_operand.vmem [shape: f32[4,256], index: 2, kind: input, shape index: {}]   ;;  %s2033_s3 = inlined_call_operand.vmem [shape: f32[2,8,64], index: 3, kind: input, shape index: {}]   ;;  %s2034_s4 = inlined_call_operand.hbm [shape: f32[8,8], index: 4, kind: output, shape index: {0}]   ;;  %s2035_s5 = inlined_call_operand.hbm [shape: f32[2,8,64], index: 5, kind: output, shape index: {1}]  }
   0x1   :  { %12 = vsyncpa [#allocation5], 0 }
   0x2   :  { %13 = vsyncpa [#allocation8], 0  ;;  %s1647_s18 = smov [#allocation3]   ;;  %s1575_s22 = scalar_lea.hbm %s2031_s1, 2048 }
   0x3   :  { %s21_s19 = sshll.u32 %s1647_s18, 4  ;;  %p1576_p0 = scmp.ne.s32.totalorder %s2031_s1, %s1575_s22  ;;  %s22_s19 = int_to_ptr.vmem [resolvable:$true] %s21_s19 }
   0x4   :  { %p1579_p1 = scmp.lt.u32.totalorder %s1575_s22, %s2031_s1 }
   0x6   :  { %p1581_p2 = pnand %p1579_p1, %p1576_p0 }
   0x8   :  { %1584 = shalt.err (!%p1581_p2)
}
   0x9   :  { %s1585_s27 = scalar_lea.vmem %s22_s19, 2048  ;;  %p1590_p4 = scmp.lt.s32.totalorder %s22_s19, %s22_s19 }
   0xa   :  { %p1586_p3 = scmp.ne.s32.totalorder %s22_s19, %s1585_s27  ;;  %p1591_p5 = scmp.lt.s32.totalorder %s1585_s27, %s1585_s27 }
   0xc   :  { %p1592_p6 = por %p1591_p5, %p1590_p4 }
   0xe   :  { %p1593_p7 = pnand %p1592_p6, %p1586_p3 }
  0x10   :  { %1596 = shalt.err (!%p1593_p7)
}
  0x11   :  { %s1648_s28 = smov 256   ;;  %s1649_s29 = smov 16  }
  0x12   :  { %27 = dma.hbm_to_vmem [thread:$0]  %s2031_s1, 2048, %s22_s19, [#allocation4], %s1648_s28, %s1648_s28, %s1649_s29  }
  0x13   :  { %1641 = dma.done.wait [#allocation4], 2048  }
  0x14   :  { %1642 = vsyncadd [#allocation4], 4294965248  ;;  %v1650_v0 = vmov 0.0   ;;  %v1651_v1 = vmov 0   ;;  %v36_v2 = vld [vmem:[#allocation3 + $0x8] sm:$0xff]  ;;  %v38_v3 = vld [vmem:[#allocation3 + $0x18] sm:$0xff]  ;;  %v105_v30 = vlaneseq }
  0x15   :  { %250 = vmatprep.mubr.f32.mxu0 %v1650_v0  ;;  %1465 = vset.pattern.permute.xlu0 %v1651_v1  ;;  %v35_v4 = vld [vmem:[#allocation3] sm:$0xff]  ;;  %v1701_v5 = vpack.c.bf16 %v38_v3, %v36_v2  ;;  %v37_v6 = vld [vmem:[#allocation3 + $0x10] sm:$0xff]  ;;  %v40_v7 = vld [vmem:[#allocation3 + $0x28] sm:$0xff]  ;;  %s1652_s10 = smov 64   ;;  %vm182_vm0 = vcmask 523264   ;;  %s1654_s8 = smov [#allocation7]  }
  0x16   :  { %362 = vmatprep.mubr.f32.mxu1 %v1650_v0  ;;  %1466 = vset.pattern.permute.xlu1 %v1651_v1  ;;  %v42_v8 = vld [vmem:[#allocation3 + $0x38] sm:$0xff]  ;;  %v1703_v9 = vpack.c.bf16 %v37_v6, %v35_v4  ;;  %v39_v11 = vld [vmem:[#allocation3 + $0x20] sm:$0xff]  ;;  %v41_v12 = vld [vmem:[#allocation3 + $0x30] sm:$0xff]  ;;  %v106_v31 = vshrl.u32 %v105_v30, 7  ;;  %v1791_v2 = vand.u32 127, %v105_v30  ;;  %s1264_s9 = sshll.u32 %s1654_s8, 4  ;;  %s1996_s9 = int_to_ptr.vmem [resolvable:$true] %s1264_s9 }
  0x17   :  { %v1705_v10 = vpack.c.bf16 %v42_v8, %v40_v7  ;;  %v44_v13 = vld [vmem:[#allocation3 + $0x48] sm:$0xff]  ;;  %1312 = vmatprep.subr.bf16.mxu0 %v1701_v5  ;;  %v46_v14 = vld [vmem:[#allocation3 + $0x58] sm:$0xff]  ;;  %1328 = vmatprep.subr.bf16.mxu1 %v1701_v5  ;;  %v1710_v15 = vpack.c.bf16 %v41_v12, %v39_v11  ;;  %v43_v17 = vld [vmem:[#allocation3 + $0x40] sm:$0xff]  ;;  %vm1244_vm10 = vcmask 64512  }
  0x18   :  { %1314 = vmatpush1.bf16.msra.mxu0 %v1703_v9  ;;  %1330 = vmatpush1.bf16.msra.mxu1 %v1703_v9  ;;  %v1714_v16 = vpack.c.bf16 %v46_v14, %v44_v13  ;;  %v45_v18 = vld [vmem:[#allocation3 + $0x50] sm:$0xff]  ;;  %v56_v19 = vld [vmem:[%s2030_s0] sm:$0xff]  ;;  %v50_v21 = vld [vmem:[#allocation3 + $0x78] sm:$0xff]  ;;  %v107_v32 = vsub.s32 0, %v106_v31  ;;  %v111_v39 = vsub.s32 1, %v106_v31  ;;  %vm176_vm1 = vcmp.lt.s32.totalorder %v1791_v2, 32 }
  0x19   :  { %1316 = vmatprep.subr.bf16.mxu0 %v1705_v10  ;;  %1332 = vmatprep.subr.bf16.mxu1 %v1705_v10  ;;  %v48_v20 = vld [vmem:[#allocation3 + $0x68] sm:$0xff]  ;;  %v1723_v22 = vld [vmem:[%s2033_s3 + $0x8] sm:$0xff]  ;;  %v1726_v23 = vpack.c.bf16 %v45_v18, %v43_v17  ;;  %v47_v25 = vld [vmem:[#allocation3 + $0x60] sm:$0xff]  ;;  %vm395_vm2 = vcmp.eq.s32.totalorder %v1791_v2, 0  ;;  %vm523_vm3 = vcmp.eq.s32.totalorder %v1791_v2, 1  ;;  %vm639_vm4 = vcmp.eq.s32.totalorder %v1791_v2, 2 }
  0x1a   :  { %66 = vperm.xlu0 %1465, %v56_v19   ;;  %v1730_v24 = vpack.c.bf16 %v50_v21, %v48_v20  ;;  %v49_v26 = vld [vmem:[#allocation3 + $0x70] sm:$0xff]  ;;  %v1748_v29 = vld [vmem:[%s2033_s3] sm:$0xff]  ;;  %vm755_vm5 = vcmp.eq.s32.totalorder %v1791_v2, 3  ;;  %vm871_vm6 = vcmp.eq.s32.totalorder %v1791_v2, 4  ;;  %vm987_vm7 = vcmp.eq.s32.totalorder %v1791_v2, 5 }
  0x1b   :  { %v57_v27 = vld [vmem:[%s2030_s0 + $0x8] sm:$0xff]  ;;  %v1739_v28 = vpack.c.bf16 %v49_v26, %v47_v25  ;;  %v51_v33 = vld [vmem:[%s2032_s2] ss:$4 sm:$0x3]  ;;  %vm1103_vm8 = vcmp.eq.s32.totalorder %v1791_v2, 6  ;;  %vm1232_vm9 = vcmp.eq.s32.totalorder %v1791_v2, 7 }
  0x1c   :  { %1318 = vmatpush1.bf16.msra.mxu0 %v1710_v15  ;;  %1334 = vmatpush1.bf16.msra.mxu1 %v1710_v15  ;;  %v1767_v34 = vrot.slane %v51_v33, %v107_v32  ;;  %v1280_v35 = vld [vmem:[%s2032_s2 + $0x1] ss:$4 sm:$0x3]  ;;  %v1778_v42 = vrot.slane %v51_v33, %v111_v39 }
  0x1d   :  { %1320 = vmatprep.subr.bf16.mxu0 %v1714_v16  ;;  %1336 = vmatprep.subr.bf16.mxu1 %v1714_v16  ;;  %v1773_v38 = vrot.slane %v1280_v35, %v107_v32  ;;  %v1782_v47 = vrot.slane %v1280_v35, %v111_v39  ;;  %v58_v39 = vld [vmem:[%s2030_s0 + $0x10] sm:$0xff] }
  0x1e   :  { %271 = vrot.lane.b32.xlu0 %v1723_v22, %s1652_s10 }
  0x20   :  { %1322 = vmatpush1.bf16.msra.mxu0 %v1726_v23  ;;  %1338 = vmatpush1.bf16.msra.mxu1 %v1726_v23 }
  0x21   :  { %1324 = vmatprep.subr.bf16.mxu0 %v1730_v24  ;;  %1340 = vmatprep.subr.bf16.mxu1 %v1730_v24 }
  0x22   :  { %71 = vperm.xlu0 %1465, %v57_v27  }
  0x24   :  { %1326 = vmatpush1.bf16.msra.mxu0 %v1739_v28  ;;  %1342 = vmatpush1.bf16.msra.mxu1 %v1739_v28 }
  0x25   :  { %1344 = vmatprep.subr.bf16.mxu0 %v1701_v5  ;;  %1360 = vmatprep.subr.bf16.mxu1 %v1701_v5 }
  0x27   :  { %1282 = vmatmul.mubr.msk.f32.vlgmr.msra.gmra.mrb[0].mxu0 %vm182_vm0, %v1748_v29 }
  0x28   :  { %1346 = vmatpush1.bf16.msra.mxu0 %v1703_v9  ;;  %494 = vmatprep.mubr.f32.mxu0 %v1650_v0 }
  0x29   :  { %1348 = vmatprep.subr.bf16.mxu0 %v1705_v10 }
  0x2c   :  { %1350 = vmatpush1.bf16.msra.mxu0 %v1710_v15 }
  0x2d   :  { %1352 = vmatprep.subr.bf16.mxu0 %v1714_v16 }
  0x30   :  { %1354 = vmatpush1.bf16.msra.mxu0 %v1726_v23 }
  0x31   :  { %1356 = vmatprep.subr.bf16.mxu0 %v1730_v24 }
  0x34   :  { %1358 = vmatpush1.bf16.msra.mxu0 %v1739_v28 }
  0x35   :  { %1376 = vmatprep.subr.bf16.mxu0 %v1701_v5 }
  0x99   :  { %v67_v36 = vpop.permute.xlu0 %66 }
  0x9a   :  { %v115_v37 = vmul.f32 %v1767_v34, %v67_v36  ;;  %v116_v46 = vmul.f32 %v1778_v42, %v67_v36 }
  0x9c   :  { %v1776_v40 = vadd.f32 %v1773_v38, %v115_v37  ;;  %v1785_v48 = vadd.f32 %v1782_v47, %v116_v46 }
  0x9d   :  { %v272_v57 = vpop.permute.xlu0 %271 }
  0xa1   :  { %v72_v8 = vpop.permute.xlu0 %71 }
  0xa2   :  { %v117_v11 = vmul.f32 %v1767_v34, %v72_v8  ;;  %v118_v19 = vmul.f32 %v1778_v42, %v72_v8 }
  0xa4   :  { %v144_v12 = vadd.f32 %v1773_v38, %v117_v11  ;;  %v145_v20 = vadd.f32 %v1782_v47, %v118_v19 }
  0xfa   :  { %v252_v41 = vpop.f32.mrb[0].mxu0 }
  0xfb   :  { %v253_v43 = vadd.f32 %v252_v41, %v1776_v40  ;;  %v254_v44 = vpop.f32.mrb[1].mxu0 }
  0xfc   :  { %v255_v49 = vadd.f32 %v254_v44, %v1785_v48 }
  0xfd   :  { %v1283_v45 = vmul.f32 -1.442695, %v253_v43 }
  0xfe   :  { %v1284_v55 = vmul.f32 -1.442695, %v255_v49 }
  0xff   :  { %1467 = vpow2.f32 %v1283_v45 }
 0x100   :  { %1469 = vtanh.f32 %v255_v49 }
 0x109   :  { %v1468_v50 = vpop.eup %1467 }
 0x10a   :  { %v263_v51 = vadd.f32 1.0, %v1468_v50  ;;  %v1470_v52 = vpop.eup %1469 }
 0x10c   :  { %1471 = vrcp.f32 %v263_v51 }
 0x10d   :  { %1473 = vpow2.f32 %v1284_v55 }
 0x116   :  { %v1472_v53 = vpop.eup %1471 }
 0x117   :  { %v275_v54 = vmul.f32 %v1472_v53, %v1470_v52  ;;  %v1474_v56 = vpop.eup %1473  ;;  %v274_v59 = vmul.f32 %v1472_v53, %v272_v57 }
 0x118   :  { %v264_v58 = vadd.f32 1.0, %v1474_v56 }
 0x119   :  { %277 = vrot.lane.b32.xlu1 %v275_v54, %s1652_s10 }
 0x11a   :  { %1475 = vrcp.f32 %v264_v58 }
 0x124   :  { %v1476_v62 = vpop.eup %1475 }
 0x18b   :  { %v278_v60 = vpop.permute.xlu1 %277 }
 0x18c   :  { %v280_v61 = vadd.f32 %v278_v60, %v274_v59 }
 0x18e   :  { %1477 = vtanh.f32 %v280_v61 }
 0x198   :  { %v1478_v63 = vpop.eup %1477 }
 0x199   :  { %v282_v1 = vmul.f32 %v1478_v63, %v1476_v62  ;;  %v59_v63 = vld [vmem:[%s2030_s0 + $0x18] sm:$0xff] }
 0x19b   :  { %284 = vrot.lane.b32.xlu1 %v282_v1, %s1652_s10 }
 0x19f   :  { %289 = vrot.lane.b32.xlu1 %v280_v61, %s1652_s10 }
 0x20d   :  { %v285_v3 = vpop.permute.xlu1 %284 }
 0x20e   :  { %v287_v4 = vsel %vm176_vm1, %v285_v3, %v1748_v29 }
 0x20f   :  { %1285 = vmatmul.mubr.msk.f32.vlgmr.msra.gmra.mrb[0].mxu1 %vm182_vm0, %v287_v4 }
 0x210   :  { %1362 = vmatpush1.bf16.msra.mxu1 %v1703_v9  ;;  %610 = vmatprep.mubr.f32.mxu1 %v1650_v0 }
 0x211   :  { %v290_v6 = vpop.permute.xlu1 %289  ;;  %1364 = vmatprep.subr.bf16.mxu1 %v1705_v10 }
 0x212   :  { %v292_v7 = vsel %vm176_vm1, %v290_v6, %v1723_v22 }
 0x213   :  { %383 = vrot.lane.b32.xlu0 %v292_v7, %s1652_s10 }
 0x214   :  { %1366 = vmatpush1.bf16.msra.mxu1 %v1710_v15 }
 0x215   :  { %1368 = vmatprep.subr.bf16.mxu1 %v1714_v16 }
 0x218   :  { %1370 = vmatpush1.bf16.msra.mxu1 %v1726_v23 }
 0x219   :  { %1372 = vmatprep.subr.bf16.mxu1 %v1730_v24 }
 0x21c   :  { %1374 = vmatpush1.bf16.msra.mxu1 %v1739_v28 }
 0x21d   :  { %1392 = vmatprep.subr.bf16.mxu1 %v1701_v5 }
 0x285   :  { %v384_v32 = vpop.permute.xlu0 %383 }
 0x2e2   :  { %v364_v13 = vpop.f32.mrb[0].mxu1 }
 0x2e3   :  { %v365_v14 = vadd.f32 %v364_v13, %v144_v12  ;;  %v366_v17 = vpop.f32.mrb[1].mxu1 }
 0x2e4   :  { %v367_v21 = vadd.f32 %v366_v17, %v145_v20 }
 0x2e5   :  { %v1286_v18 = vmul.f32 -1.442695, %v365_v14 }
 0x2e6   :  { %v1287_v30 = vmul.f32 -1.442695, %v367_v21 }
 0x2e7   :  { %1479 = vpow2.f32 %v1286_v18 }
 0x2e8   :  { %1481 = vtanh.f32 %v367_v21 }
 0x2f1   :  { %v1480_v22 = vpop.eup %1479 }
 0x2f2   :  { %v375_v25 = vadd.f32 1.0, %v1480_v22  ;;  %v1482_v26 = vpop.eup %1481 }
 0x2f4   :  { %1483 = vrcp.f32 %v375_v25 }
 0x2f5   :  { %1485 = vpow2.f32 %v1287_v30 }
 0x2fe   :  { %v1484_v27 = vpop.eup %1483 }
 0x2ff   :  { %v387_v29 = vmul.f32 %v1484_v27, %v1482_v26  ;;  %v1486_v31 = vpop.eup %1485  ;;  %v386_v35 = vmul.f32 %v1484_v27, %v384_v32 }
 0x300   :  { %v376_v33 = vadd.f32 1.0, %v1486_v31 }
 0x301   :  { %389 = vrot.lane.b32.xlu1 %v387_v29, %s1652_s10 }
 0x302   :  { %1487 = vrcp.f32 %v376_v33 }
 0x305   :  { %76 = vperm.xlu1 %1466, %v58_v39  }
 0x30c   :  { %v1488_v41 = vpop.eup %1487 }
 0x373   :  { %v390_v36 = vpop.permute.xlu1 %389 }
 0x374   :  { %v392_v37 = vadd.f32 %v390_v36, %v386_v35  ;;  %v60_v36 = vld [vmem:[%s2030_s0 + $0x20] sm:$0xff] }
 0x376   :  { %1489 = vtanh.f32 %v392_v37 }
 0x380   :  { %v1490_v43 = vpop.eup %1489 }
 0x381   :  { %v1819_v44 = vmul.f32 %v1490_v43, %v1488_v41 }
 0x383   :  { %426 = vrot.lane.b32.xlu0 %v1819_v44, %s1652_s10 }
 0x384   :  { %v77_v46 = vpop.permute.xlu1 %76 }
 0x385   :  { %v119_v49 = vmul.f32 %v1767_v34, %v77_v46  ;;  %v120_v55 = vmul.f32 %v1778_v42, %v77_v46 }
 0x387   :  { %v146_v50 = vadd.f32 %v1773_v38, %v119_v49  ;;  %v147_v56 = vadd.f32 %v1782_v47, %v120_v55 }
 0x3f5   :  { %v427_v45 = vpop.permute.xlu0 %426 }
 0x3f6   :  { %1290 = vmatmul.mubr.msk.f32.vlgmr.msra.gmra.mrb[2].mxu0 %vm182_vm0, %v427_v45 }
 0x3f7   :  { %1378 = vmatpush1.bf16.msra.mxu0 %v1703_v9  ;;  %726 = vmatprep.mubr.f32.mxu0 %v1650_v0 }
 0x3f8   :  { %1380 = vmatprep.subr.bf16.mxu0 %v1705_v10 }
 0x3fb   :  { %1382 = vmatpush1.bf16.msra.mxu0 %v1710_v15 }
 0x3fc   :  { %1384 = vmatprep.subr.bf16.mxu0 %v1714_v16 }
 0x3ff   :  { %1386 = vmatpush1.bf16.msra.mxu0 %v1726_v23 }
 0x400   :  { %1388 = vmatprep.subr.bf16.mxu0 %v1730_v24 }
 0x403   :  { %1390 = vmatpush1.bf16.msra.mxu0 %v1739_v28 }
 0x404   :  { %1408 = vmatprep.subr.bf16.mxu0 %v1701_v5 }
 0x4c9   :  { %v496_v51 = vpop.f32.mrb[2].mxu0 }
 0x4ca   :  { %v497_v52 = vadd.f32 %v496_v51, %v146_v50  ;;  %v498_v53 = vpop.f32.mrb[3].mxu0 }
 0x4cb   :  { %v499_v57 = vadd.f32 %v498_v53, %v147_v56 }
 0x4cc   :  { %v1291_v54 = vmul.f32 -1.442695, %v497_v52 }
 0x4cd   :  { %v1292_v1 = vmul.f32 -1.442695, %v499_v57 }
 0x4ce   :  { %1491 = vpow2.f32 %v1291_v54 }
 0x4cf   :  { %1493 = vtanh.f32 %v499_v57 }
 0x4d8   :  { %v1492_v58 = vpop.eup %1491 }
 0x4d9   :  { %v507_v59 = vadd.f32 1.0, %v1492_v58  ;;  %v1494_v60 = vpop.eup %1493 }
 0x4db   :  { %1495 = vrcp.f32 %v507_v59 }
 0x4dc   :  { %1497 = vpow2.f32 %v1292_v1 }
 0x4e5   :  { %v1496_v61 = vpop.eup %1495 }
 0x4e6   :  { %v515_v62 = vmul.f32 %v1496_v61, %v1494_v60  ;;  %v1498_v3 = vpop.eup %1497  ;;  %v514_v6 = vmul.f32 %v1496_v61, %v392_v37 }
 0x4e7   :  { %v508_v4 = vadd.f32 1.0, %v1498_v3 }
 0x4e8   :  { %517 = vrot.lane.b32.xlu0 %v515_v62, %s1652_s10 }
 0x4e9   :  { %1499 = vrcp.f32 %v508_v4 }
 0x4ec   :  { %81 = vperm.xlu0 %1465, %v59_v63  }
 0x4f3   :  { %v1500_v11 = vpop.eup %1499 }
 0x55a   :  { %v518_v7 = vpop.permute.xlu0 %517 }
 0x55b   :  { %v520_v8 = vadd.f32 %v518_v7, %v514_v6  ;;  %v61_v6 = vld [vmem:[%s2030_s0 + $0x28] sm:$0xff] }
 0x55d   :  { %1501 = vtanh.f32 %v520_v8 }
 0x567   :  { %v1502_v12 = vpop.eup %1501 }
 0x568   :  { %v1841_v13 = vmul.f32 %v1502_v12, %v1500_v11 }
 0x56a   :  { %542 = vrot.lane.b32.xlu1 %v1841_v13, %s1652_s10 }
 0x56b   :  { %v82_v17 = vpop.permute.xlu0 %81 }
 0x56c   :  { %v121_v18 = vmul.f32 %v1767_v34, %v82_v17  ;;  %v122_v26 = vmul.f32 %v1778_v42, %v82_v17 }
 0x56e   :  { %v148_v19 = vadd.f32 %v1773_v38, %v121_v18  ;;  %v149_v27 = vadd.f32 %v1782_v47, %v122_v26 }
 0x5dc   :  { %v543_v14 = vpop.permute.xlu1 %542 }
 0x5dd   :  { %1293 = vmatmul.mubr.msk.f32.vlgmr.msra.gmra.mrb[2].mxu1 %vm182_vm0, %v543_v14 }
 0x5de   :  { %1394 = vmatpush1.bf16.msra.mxu1 %v1703_v9  ;;  %842 = vmatprep.mubr.f32.mxu1 %v1650_v0 }
 0x5df   :  { %1396 = vmatprep.subr.bf16.mxu1 %v1705_v10 }
 0x5e2   :  { %1398 = vmatpush1.bf16.msra.mxu1 %v1710_v15 }
 0x5e3   :  { %1400 = vmatprep.subr.bf16.mxu1 %v1714_v16 }
 0x5e6   :  { %1402 = vmatpush1.bf16.msra.mxu1 %v1726_v23 }
 0x5e7   :  { %1404 = vmatprep.subr.bf16.mxu1 %v1730_v24 }
 0x5ea   :  { %1406 = vmatpush1.bf16.msra.mxu1 %v1739_v28 }
 0x5eb   :  { %1424 = vmatprep.subr.bf16.mxu1 %v1701_v5 }
 0x6b0   :  { %v612_v20 = vpop.f32.mrb[2].mxu1 }
 0x6b1   :  { %v613_v21 = vadd.f32 %v612_v20, %v148_v19  ;;  %v614_v22 = vpop.f32.mrb[3].mxu1 }
 0x6b2   :  { %v615_v29 = vadd.f32 %v614_v22, %v149_v27 }
 0x6b3   :  { %v1294_v25 = vmul.f32 -1.442695, %v613_v21 }
 0x6b4   :  { %v1295_v37 = vmul.f32 -1.442695, %v615_v29 }
 0x6b5   :  { %1503 = vpow2.f32 %v1294_v25 }
 0x6b6   :  { %1505 = vtanh.f32 %v615_v29 }
 0x6bf   :  { %v1504_v30 = vpop.eup %1503 }
 0x6c0   :  { %v623_v31 = vadd.f32 1.0, %v1504_v30  ;;  %v1506_v32 = vpop.eup %1505 }
 0x6c2   :  { %1507 = vrcp.f32 %v623_v31 }
 0x6c3   :  { %1509 = vpow2.f32 %v1295_v37 }
 0x6cc   :  { %v1508_v33 = vpop.eup %1507 }
 0x6cd   :  { %v631_v35 = vmul.f32 %v1508_v33, %v1506_v32  ;;  %v1510_v39 = vpop.eup %1509  ;;  %v630_v43 = vmul.f32 %v1508_v33, %v520_v8 }
 0x6ce   :  { %v624_v41 = vadd.f32 1.0, %v1510_v39 }
 0x6cf   :  { %633 = vrot.lane.b32.xlu1 %v631_v35, %s1652_s10 }
 0x6d0   :  { %1511 = vrcp.f32 %v624_v41 }
 0x6d3   :  { %86 = vperm.xlu1 %1466, %v60_v36  }
 0x6da   :  { %v1512_v49 = vpop.eup %1511 }
 0x741   :  { %v634_v45 = vpop.permute.xlu1 %633 }
 0x742   :  { %v636_v46 = vadd.f32 %v634_v45, %v630_v43  ;;  %v62_v45 = vld [vmem:[%s2030_s0 + $0x30] sm:$0xff] }
 0x744   :  { %1513 = vtanh.f32 %v636_v46 }
 0x74e   :  { %v1514_v50 = vpop.eup %1513 }
 0x74f   :  { %v1863_v51 = vmul.f32 %v1514_v50, %v1512_v49 }
 0x751   :  { %658 = vrot.lane.b32.xlu0 %v1863_v51, %s1652_s10 }
 0x752   :  { %v87_v53 = vpop.permute.xlu1 %86 }
 0x753   :  { %v123_v54 = vmul.f32 %v1767_v34, %v87_v53  ;;  %v124_v60 = vmul.f32 %v1778_v42, %v87_v53 }
 0x755   :  { %v150_v55 = vadd.f32 %v1773_v38, %v123_v54  ;;  %v151_v61 = vadd.f32 %v1782_v47, %v124_v60 }
 0x7c3   :  { %v659_v52 = vpop.permute.xlu0 %658 }
 0x7c4   :  { %1296 = vmatmul.mubr.msk.f32.vlgmr.msra.gmra.mrb[4].mxu0 %vm182_vm0, %v659_v52 }
 0x7c5   :  { %1410 = vmatpush1.bf16.msra.mxu0 %v1703_v9  ;;  %958 = vmatprep.mubr.f32.mxu0 %v1650_v0 }
 0x7c6   :  { %1412 = vmatprep.subr.bf16.mxu0 %v1705_v10 }
 0x7c9   :  { %1414 = vmatpush1.bf16.msra.mxu0 %v1710_v15 }
 0x7ca   :  { %1416 = vmatprep.subr.bf16.mxu0 %v1714_v16 }
 0x7cd   :  { %1418 = vmatpush1.bf16.msra.mxu0 %v1726_v23 }
 0x7ce   :  { %1420 = vmatprep.subr.bf16.mxu0 %v1730_v24 }
 0x7d1   :  { %1422 = vmatpush1.bf16.msra.mxu0 %v1739_v28 }
 0x7d2   :  { %1440 = vmatprep.subr.bf16.mxu0 %v1701_v5 }
 0x897   :  { %v728_v56 = vpop.f32.mrb[4].mxu0 }
 0x898   :  { %v729_v57 = vadd.f32 %v728_v56, %v150_v55  ;;  %v730_v58 = vpop.f32.mrb[5].mxu0 }
 0x899   :  { %v731_v62 = vadd.f32 %v730_v58, %v151_v61 }
 0x89a   :  { %v1297_v59 = vmul.f32 -1.442695, %v729_v57 }
 0x89b   :  { %v1298_v7 = vmul.f32 -1.442695, %v731_v62 }
 0x89c   :  { %1515 = vpow2.f32 %v1297_v59 }
 0x89d   :  { %1517 = vtanh.f32 %v731_v62 }
 0x8a6   :  { %v1516_v63 = vpop.eup %1515 }
 0x8a7   :  { %v739_v1 = vadd.f32 1.0, %v1516_v63  ;;  %v1518_v5 = vpop.eup %1517 }
 0x8a9   :  { %1519 = vrcp.f32 %v739_v1 }
 0x8aa   :  { %1521 = vpow2.f32 %v1298_v7 }
 0x8b3   :  { %v1520_v3 = vpop.eup %1519 }
 0x8b4   :  { %v747_v4 = vmul.f32 %v1520_v3, %v1518_v5  ;;  %v1522_v8 = vpop.eup %1521  ;;  %v746_v12 = vmul.f32 %v1520_v3, %v636_v46  ;;  %v63_v3 = vld [vmem:[%s2030_s0 + $0x38] sm:$0xff] }
 0x8b5   :  { %v740_v11 = vadd.f32 1.0, %v1522_v8 }
 0x8b6   :  { %749 = vrot.lane.b32.xlu0 %v747_v4, %s1652_s10 }
 0x8b7   :  { %1523 = vrcp.f32 %v740_v11 }
 0x8ba   :  { %91 = vperm.xlu0 %1465, %v61_v6  }
 0x8c1   :  { %v1524_v18 = vpop.eup %1523 }
 0x928   :  { %v750_v14 = vpop.permute.xlu0 %749 }
 0x929   :  { %v752_v17 = vadd.f32 %v750_v14, %v746_v12 }
 0x92b   :  { %1525 = vtanh.f32 %v752_v17 }
 0x935   :  { %v1526_v19 = vpop.eup %1525 }
 0x936   :  { %v1885_v20 = vmul.f32 %v1526_v19, %v1524_v18 }
 0x938   :  { %774 = vrot.lane.b32.xlu1 %v1885_v20, %s1652_s10 }
 0x939   :  { %v92_v22 = vpop.permute.xlu0 %91 }
 0x93a   :  { %v125_v25 = vmul.f32 %v1767_v34, %v92_v22  ;;  %v126_v32 = vmul.f32 %v1778_v42, %v92_v22 }
 0x93c   :  { %v152_v26 = vadd.f32 %v1773_v38, %v125_v25  ;;  %v153_v33 = vadd.f32 %v1782_v47, %v126_v32 }
 0x9aa   :  { %v775_v21 = vpop.permute.xlu1 %774 }
 0x9ab   :  { %1299 = vmatmul.mubr.msk.f32.vlgmr.msra.gmra.mrb[4].mxu1 %vm182_vm0, %v775_v21 }
 0x9ac   :  { %1426 = vmatpush1.bf16.msra.mxu1 %v1703_v9  ;;  %1074 = vmatprep.mubr.f32.mxu1 %v1650_v0 }
 0x9ad   :  { %1428 = vmatprep.subr.bf16.mxu1 %v1705_v10 }
 0x9b0   :  { %1430 = vmatpush1.bf16.msra.mxu1 %v1710_v15 }
 0x9b1   :  { %1432 = vmatprep.subr.bf16.mxu1 %v1714_v16 }
 0x9b4   :  { %1434 = vmatpush1.bf16.msra.mxu1 %v1726_v23 }
 0x9b5   :  { %1436 = vmatprep.subr.bf16.mxu1 %v1730_v24 }
 0x9b8   :  { %1438 = vmatpush1.bf16.msra.mxu1 %v1739_v28 }
 0xa7e   :  { %v844_v27 = vpop.f32.mrb[4].mxu1 }
 0xa7f   :  { %v845_v29 = vadd.f32 %v844_v27, %v152_v26  ;;  %v846_v30 = vpop.f32.mrb[5].mxu1 }
 0xa80   :  { %v847_v35 = vadd.f32 %v846_v30, %v153_v33 }
 0xa81   :  { %v1300_v31 = vmul.f32 -1.442695, %v845_v29 }
 0xa82   :  { %v1301_v46 = vmul.f32 -1.442695, %v847_v35 }
 0xa83   :  { %1527 = vpow2.f32 %v1300_v31 }
 0xa84   :  { %1529 = vtanh.f32 %v847_v35 }
 0xa8d   :  { %v1528_v36 = vpop.eup %1527 }
 0xa8e   :  { %v855_v37 = vadd.f32 1.0, %v1528_v36  ;;  %v1530_v39 = vpop.eup %1529 }
 0xa90   :  { %1531 = vrcp.f32 %v855_v37 }
 0xa91   :  { %1533 = vpow2.f32 %v1301_v46 }
 0xa9a   :  { %v1532_v41 = vpop.eup %1531 }
 0xa9b   :  { %v863_v43 = vmul.f32 %v1532_v41, %v1530_v39  ;;  %v1534_v49 = vpop.eup %1533  ;;  %v862_v52 = vmul.f32 %v1532_v41, %v752_v17 }
 0xa9c   :  { %v856_v50 = vadd.f32 1.0, %v1534_v49 }
 0xa9d   :  { %865 = vrot.lane.b32.xlu1 %v863_v43, %s1652_s10 }
 0xa9e   :  { %1535 = vrcp.f32 %v856_v50 }
 0xaa1   :  { %96 = vperm.xlu1 %1466, %v62_v45  }
 0xaa8   :  { %v1536_v55 = vpop.eup %1535 }
 0xb0f   :  { %v866_v53 = vpop.permute.xlu1 %865 }
 0xb10   :  { %v868_v54 = vadd.f32 %v866_v53, %v862_v52 }
 0xb12   :  { %1537 = vtanh.f32 %v868_v54 }
 0xb1c   :  { %v1538_v56 = vpop.eup %1537 }
 0xb1d   :  { %v1906_v57 = vmul.f32 %v1538_v56, %v1536_v55 }
 0xb1f   :  { %890 = vrot.lane.b32.xlu0 %v1906_v57, %s1652_s10 }
 0xb20   :  { %v97_v59 = vpop.permute.xlu1 %96 }
 0xb21   :  { %v127_v60 = vmul.f32 %v1767_v34, %v97_v59 }
 0xb23   :  { %v154_v61 = vadd.f32 %v1773_v38, %v127_v60 }
 0xb91   :  { %v891_v58 = vpop.permute.xlu0 %890 }
 0xb92   :  { %1302 = vmatmul.mubr.msk.f32.vlgmr.msra.gmra.mrb[6].mxu0 %vm182_vm0, %v891_v58 }
 0xb93   :  { %1442 = vmatpush1.bf16.msra.mxu0 %v1703_v9  ;;  %1188 = vmatprep.mubr.f32.mxu0 %v1650_v0 }
 0xb94   :  { %1444 = vmatprep.subr.bf16.mxu0 %v1705_v10  ;;  %v128_v10 = vmul.f32 %v1778_v42, %v97_v59 }
 0xb97   :  { %1446 = vmatpush1.bf16.msra.mxu0 %v1710_v15  ;;  %v155_v15 = vadd.f32 %v1782_v47, %v128_v10 }
 0xb98   :  { %1448 = vmatprep.subr.bf16.mxu0 %v1714_v16 }
 0xb9b   :  { %1450 = vmatpush1.bf16.msra.mxu0 %v1726_v23 }
 0xb9c   :  { %1452 = vmatprep.subr.bf16.mxu0 %v1730_v24 }
 0xb9f   :  { %1454 = vmatpush1.bf16.msra.mxu0 %v1739_v28 }
 0xc65   :  { %v960_v9 = vpop.f32.mrb[6].mxu0 }
 0xc66   :  { %v961_v62 = vadd.f32 %v960_v9, %v154_v61  ;;  %v962_v0 = vpop.f32.mrb[7].mxu0 }
 0xc67   :  { %v963_v16 = vadd.f32 %v962_v0, %v155_v15 }
 0xc68   :  { %v1303_v63 = vmul.f32 -1.442695, %v961_v62 }
 0xc69   :  { %v1304_v4 = vmul.f32 -1.442695, %v963_v16 }
 0xc6a   :  { %1539 = vpow2.f32 %v1303_v63 }
 0xc6b   :  { %1541 = vtanh.f32 %v963_v16 }
 0xc74   :  { %v1540_v23 = vpop.eup %1539 }
 0xc75   :  { %v971_v1 = vadd.f32 1.0, %v1540_v23  ;;  %v1542_v24 = vpop.eup %1541 }
 0xc77   :  { %1543 = vrcp.f32 %v971_v1 }
 0xc78   :  { %1545 = vpow2.f32 %v1304_v4 }
 0xc81   :  { %v1544_v28 = vpop.eup %1543 }
 0xc82   :  { %v979_v5 = vmul.f32 %v1544_v28, %v1542_v24  ;;  %v1546_v6 = vpop.eup %1545  ;;  %v978_v8 = vmul.f32 %v1544_v28, %v868_v54 }
 0xc83   :  { %v972_v7 = vadd.f32 1.0, %v1546_v6 }
 0xc84   :  { %981 = vrot.lane.b32.xlu0 %v979_v5, %s1652_s10 }
 0xc85   :  { %1547 = vrcp.f32 %v972_v7 }
 0xc88   :  { %101 = vperm.xlu0 %1465, %v63_v3  }
 0xc8f   :  { %v1548_v14 = vpop.eup %1547 }
 0xcf6   :  { %v982_v11 = vpop.permute.xlu0 %981 }
 0xcf7   :  { %v984_v12 = vadd.f32 %v982_v11, %v978_v8 }
 0xcf9   :  { %1549 = vtanh.f32 %v984_v12 }
 0xd03   :  { %v1550_v17 = vpop.eup %1549 }
 0xd04   :  { %v1927_v18 = vmul.f32 %v1550_v17, %v1548_v14 }
 0xd06   :  { %1006 = vrot.lane.b32.xlu1 %v1927_v18, %s1652_s10 }
 0xd07   :  { %v102_v21 = vpop.permute.xlu0 %101 }
 0xd08   :  { %v129_v22 = vmul.f32 %v1767_v34, %v102_v21  ;;  %v130_v31 = vmul.f32 %v1778_v42, %v102_v21  ;;  %v1940_v34 = vld [vmem:[%s2032_s2 + $0x2] ss:$0 sm:$0xff] }
 0xd0a   :  { %v156_v25 = vadd.f32 %v1773_v38, %v129_v22  ;;  %v157_v32 = vadd.f32 %v1782_v47, %v130_v31 }
 0xd78   :  { %v1007_v19 = vpop.permute.xlu1 %1006 }
 0xd79   :  { %1305 = vmatmul.mubr.msk.f32.vlgmr.msra.gmra.mrb[6].mxu1 %vm182_vm0, %v1007_v19 }
 0xe4c   :  { %v1076_v26 = vpop.f32.mrb[6].mxu1 }
 0xe4d   :  { %v1077_v27 = vadd.f32 %v1076_v26, %v156_v25  ;;  %v1078_v29 = vpop.f32.mrb[7].mxu1 }
 0xe4e   :  { %v1079_v33 = vadd.f32 %v1078_v29, %v157_v32 }
 0xe4f   :  { %v1306_v30 = vmul.f32 -1.442695, %v1077_v27 }
 0xe50   :  { %v1307_v38 = vmul.f32 -1.442695, %v1079_v33 }
 0xe51   :  { %1551 = vpow2.f32 %v1306_v30 }
 0xe52   :  { %1553 = vtanh.f32 %v1079_v33 }
 0xe5b   :  { %v1552_v35 = vpop.eup %1551 }
 0xe5c   :  { %v1087_v36 = vadd.f32 1.0, %v1552_v35  ;;  %v1554_v37 = vpop.eup %1553 }
 0xe5e   :  { %1555 = vrcp.f32 %v1087_v36 }
 0xe5f   :  { %1557 = vpow2.f32 %v1307_v38 }
 0xe68   :  { %v1556_v39 = vpop.eup %1555 }
 0xe69   :  { %v1095_v41 = vmul.f32 %v1556_v39, %v1554_v37  ;;  %v1558_v42 = vpop.eup %1557  ;;  %v1094_v43 = vmul.f32 %v1556_v39, %v984_v12  ;;  %v1289_v37 = vld [vmem:[%s2032_s2 + $0x3] ss:$0 sm:$0xff]  ;;  %s1653_s2 = smov [#allocation6]  }
 0xe6a   :  { %v1088_v47 = vadd.f32 1.0, %v1558_v42  ;;  %s1255_s7 = sshll.u32 %s1653_s2, 4  ;;  %s1256_s7 = int_to_ptr.vmem [resolvable:$true] %s1255_s7 }
 0xe6b   :  { %1097 = vrot.lane.b32.xlu1 %v1095_v41, %s1652_s10  ;;  %p1602_p9 = scmp.lt.s32.totalorder %s1256_s7, %s1256_s7 }
 0xe6c   :  { %1559 = vrcp.f32 %v1088_v47 }
 0xe6f   :  { %401 = vrot.lane.b32.xlu1 %v1940_v34, %s1652_s10 }
 0xe76   :  { %v1560_v49 = vpop.eup %1559 }
 0xedd   :  { %v1098_v45 = vpop.permute.xlu1 %1097 }
 0xede   :  { %v1944_v46 = vadd.f32 %v1098_v45, %v1094_v43 }
 0xee0   :  { %1561 = vtanh.f32 %v1944_v46 }
 0xee1   :  { %v402_v53 = vpop.permute.xlu1 %401 }
 0xee2   :  { %v404_v54 = vmul.f32 %v402_v53, %v1819_v44  ;;  %v524_v55 = vmul.f32 %v1841_v13, %v402_v53  ;;  %v756_v9 = vmul.f32 %v1885_v20, %v402_v53  ;;  %v640_v5 = vmul.f32 %v1863_v51, %v402_v53 }
 0xee3   :  { %v872_v19 = vmul.f32 %v1906_v57, %v402_v53  ;;  %v988_v21 = vmul.f32 %v1927_v18, %v402_v53 }
 0xeea   :  { %v1562_v50 = vpop.eup %1561 }
 0xeeb   :  { %v1102_v52 = vmul.f32 %v1562_v50, %v1560_v49 }
 0xeed   :  { %1120 = vrot.lane.b32.xlu0 %v1102_v52, %s1652_s10  ;;  %v1104_v22 = vmul.f32 %v1102_v52, %v402_v53 }
 0xef1   :  { %406 = vrot.lane.b32.xlu0 %v404_v54, %s1652_s10 }
 0xef5   :  { %526 = vrot.lane.b32.xlu0 %v524_v55, %s1652_s10 }
 0xf5f   :  { %v1121_v56 = vpop.permute.xlu0 %1120 }
 0xf60   :  { %1308 = vmatmul.mubr.msk.f32.vlgmr.msra.gmra.mrb[8].mxu0 %vm182_vm0, %v1121_v56 }
 0xf63   :  { %v407_v58 = vpop.permute.xlu0 %406 }
 0xf64   :  { %v409_v59 = vsel %vm182_vm0, %v407_v58, 0.0 }
 0xf65   :  { %410 = vadd.xlane.f32.xlu1 %v409_v59 }
 0xf67   :  { %v527_v60 = vpop.permute.xlu0 %526 }
 0xf68   :  { %v529_v61 = vsel %vm182_vm0, %v527_v60, 0.0 }
 0xf69   :  { %530 = vadd.xlane.f32.xlu0 %v529_v61 }
 0xf7f   :  { %758 = vrot.lane.b32.xlu0 %v756_v9, %s1652_s10 }
 0xff2   :  { %v411_v4 = vpop.xlane.xlu1 %410 }
 0xff3   :  { %v416_v41 = vadd.f32 %v1289_v37, %v411_v4 }
 0xff6   :  { %v1957_v44 = vpop.xlane.xlu0 %530 }
 0xff7   :  { %v532_v38 = vadd.f32 %v1289_v37, %v1957_v44 }
 0xffa   :  { %v759_v13 = vpop.permute.xlu0 %758 }
 0xffb   :  { %v761_v62 = vsel %vm182_vm0, %v759_v13, 0.0 }
 0xffc   :  { %762 = vadd.xlane.f32.xlu0 %v761_v62 }
0x1033   :  { %v1190_v0 = vpop.f32.mrb[8].mxu0 }
0x1034   :  { %v1191_v63 = vadd.f32 %v1190_v0, %v1776_v40  ;;  %v1192_v10 = vpop.f32.mrb[9].mxu0 }
0x1035   :  { %v1193_v16 = vadd.f32 %v1192_v10, %v1785_v48 }
0x1036   :  { %v1309_v15 = vmul.f32 -1.442695, %v1191_v63 }
0x1037   :  { %v1310_v3 = vmul.f32 -1.442695, %v1193_v16 }
0x1038   :  { %1563 = vpow2.f32 %v1309_v15 }
0x1039   :  { %1565 = vtanh.f32 %v1193_v16 }
0x1042   :  { %v1564_v23 = vpop.eup %1563 }
0x1043   :  { %v1201_v1 = vadd.f32 1.0, %v1564_v23  ;;  %v1566_v20 = vpop.eup %1565 }
0x1045   :  { %1567 = vrcp.f32 %v1201_v1 }
0x1046   :  { %1569 = vpow2.f32 %v1310_v3 }
0x104f   :  { %v1568_v24 = vpop.eup %1567 }
0x1050   :  { %v1209_v28 = vmul.f32 %v1568_v24, %v1566_v20  ;;  %v1570_v40 = vpop.eup %1569  ;;  %v1208_v48 = vmul.f32 %v1568_v24, %v1944_v46 }
0x1051   :  { %v1202_v6 = vadd.f32 1.0, %v1570_v40 }
0x1052   :  { %1211 = vrot.lane.b32.xlu1 %v1209_v28, %s1652_s10 }
0x1053   :  { %1571 = vrcp.f32 %v1202_v6 }
0x1056   :  { %642 = vrot.lane.b32.xlu1 %v640_v5, %s1652_s10 }
0x105d   :  { %v1572_v14 = vpop.eup %1571 }
0x1089   :  { %v763_v25 = vpop.xlane.xlu0 %762 }
0x108a   :  { %v764_v39 = vadd.f32 %v1289_v37, %v763_v25 }
0x10c4   :  { %v1212_v7 = vpop.permute.xlu1 %1211 }
0x10c5   :  { %v1214_v8 = vadd.f32 %v1212_v7, %v1208_v48 }
0x10c7   :  { %1573 = vtanh.f32 %v1214_v8 }
0x10c8   :  { %v643_v11 = vpop.permute.xlu1 %642 }
0x10c9   :  { %v645_v12 = vsel %vm182_vm0, %v643_v11, 0.0 }
0x10ca   :  { %646 = vadd.xlane.f32.xlu1 %v645_v12 }
0x10d1   :  { %v1574_v17 = vpop.eup %1573 }
0x10d2   :  { %v1216_v51 = vmul.f32 %v1574_v17, %v1572_v14 }
0x10d4   :  { %1219 = vrot.lane.b32.xlu0 %v1216_v51, %s1652_s10 }
0x10db   :  { %874 = vrot.lane.b32.xlu1 %v872_v19, %s1652_s10 }
0x10df   :  { %990 = vrot.lane.b32.xlu1 %v988_v21, %s1652_s10 }
0x10e3   :  { %1106 = vrot.lane.b32.xlu1 %v1104_v22, %s1652_s10 }
0x1146   :  { %v1220_v26 = vpop.permute.xlu0 %1219 }
0x1147   :  { %v1222_v27 = vsel %vm176_vm1, %v1121_v56, %v1220_v26 }
0x1148   :  { %1246 = vst.msk [vmem:[#allocation7] sm:$0xff] %vm182_vm0, %v1222_v27  ;;  %v1233_v32 = vmul.f32 %v1940_v34, %v1222_v27 }
0x114a   :  { %v1234_v35 = vsel %vm182_vm0, %v1233_v32, 0.0 }
0x1157   :  { %v647_v29 = vpop.xlane.xlu1 %646 }
0x1158   :  { %v648_v34 = vadd.f32 %v1289_v37, %v647_v29 }
0x115b   :  { %v875_v30 = vpop.permute.xlu1 %874 }
0x115c   :  { %v877_v57 = vsel %vm182_vm0, %v875_v30, 0.0 }
0x115d   :  { %878 = vadd.xlane.f32.xlu1 %v877_v57 }
0x115f   :  { %v991_v31 = vpop.permute.xlu1 %990 }
0x1160   :  { %v993_v18 = vsel %vm182_vm0, %v991_v31, 0.0 }
0x1161   :  { %994 = vadd.xlane.f32.xlu0 %v993_v18 }
0x1163   :  { %v1107_v33 = vpop.permute.xlu1 %1106 }
0x1164   :  { %v1109_v36 = vsel %vm182_vm0, %v1107_v33, 0.0 }
0x1165   :  { %1235 = vadd.xlane.f32.xlu0 %v1234_v35  ;;  %1110 = vadd.xlane.f32.xlu1 %v1109_v36 }
0x1176   :  { %767 = vperm.xlu1 %1466, %v764_v39  }
0x117b   :  { %419 = vperm.xlu0 %1465, %v416_v41  }
0x117f   :  { %535 = vperm.xlu0 %1465, %v532_v38  }
0x1183   :  { %651 = vperm.xlu0 %1465, %v648_v34  }
0x11ea   :  { %v879_v42 = vpop.xlane.xlu1 %878 }
0x11eb   :  { %v880_v47 = vadd.f32 %v1289_v37, %v879_v42 }
0x11ed   :  { %883 = vperm.xlu0 %1465, %v880_v47  }
0x11ee   :  { %v995_v43 = vpop.xlane.xlu0 %994 }
0x11ef   :  { %v996_v45 = vadd.f32 %v1289_v37, %v995_v43 }
0x11f1   :  { %999 = vperm.xlu1 %1466, %v996_v45  }
0x11f2   :  { %v1111_v49 = vpop.xlane.xlu1 %1110  ;;  %v1236_v52 = vpop.xlane.xlu0 %1235 }
0x11f3   :  { %v1112_v50 = vadd.f32 %v1289_v37, %v1111_v49  ;;  %v1237_v53 = vadd.f32 %v1289_v37, %v1236_v52 }
0x11f5   :  { %1224 = vrot.lane.b32.xlu1 %v1944_v46, %s1652_s10  ;;  %1115 = vperm.xlu0 %1465, %v1112_v50  }
0x11f6   :  { %v768_v56 = vpop.permute.xlu1 %767 }
0x11f9   :  { %1228 = vrot.lane.b32.xlu1 %v1214_v8, %s1652_s10  ;;  %1240 = vperm.xlu0 %1465, %v1237_v53   ;;  %s1597_s10 = scalar_lea.vmem %s1256_s7, 128 }
0x11fa   :  { %v420_v54 = vpop.permute.xlu0 %419  ;;  %p1598_p8 = scmp.ne.s32.totalorder %s1256_s7, %s1597_s10  ;;  %p1603_p10 = scmp.lt.s32.totalorder %s1597_s10, %s1597_s10 }
0x11fb   :  { %v422_v59 = vsel %vm395_vm2, %v420_v54, 0.0 }
0x11fc   :  { %p1604_p11 = por %p1603_p10, %p1602_p9 }
0x11fe   :  { %v536_v55 = vpop.permute.xlu0 %535  ;;  %p1605_p12 = pnand %p1604_p11, %p1598_p8 }
0x11ff   :  { %v538_v9 = vsel %vm523_vm3, %v536_v55, %v422_v59 }
0x1202   :  { %v652_v58 = vpop.permute.xlu0 %651 }
0x1203   :  { %v654_v46 = vsel %vm639_vm4, %v652_v58, %v538_v9 }
0x1204   :  { %v770_v62 = vsel %vm755_vm5, %v768_v56, %v654_v46 }
0x126c   :  { %v884_v60 = vpop.permute.xlu0 %883 }
0x126d   :  { %v886_v0 = vsel %vm871_vm6, %v884_v60, %v770_v62 }
0x1270   :  { %v1000_v61 = vpop.permute.xlu1 %999 }
0x1271   :  { %v1002_v63 = vsel %vm987_vm7, %v1000_v61, %v886_v0 }
0x1274   :  { %v1116_v44 = vpop.permute.xlu0 %1115  ;;  %v1225_v13 = vpop.permute.xlu1 %1224 }
0x1275   :  { %v1118_v10 = vsel %vm1103_vm8, %v1116_v44, %v1002_v63 }
0x1278   :  { %v1241_v15 = vpop.permute.xlu0 %1240  ;;  %v1229_v16 = vpop.permute.xlu1 %1228 }
0x1279   :  { %v1243_v23 = vsel %vm1232_vm9, %v1241_v15, %v1118_v10  ;;  %v1231_v1 = vsel %vm176_vm1, %v1225_v13, %v1229_v16 }
0x127a   :  { %1248 = vst.msk [vmem:[#allocation7 + $0x8] sm:$0xff] %vm182_vm0, %v1231_v1 }
0x127b   :  { %1245 = vst.msk [vmem:[#allocation6] sm:$0xff] %vm1244_vm10, %v1243_v23 }
0x127c   :  { %1608 = shalt.err (!%p1605_p12)
}
0x127d   :  { %s1609_s13 = scalar_lea.hbm %s2034_s4, 128 }
0x127e   :  { %p1610_p13 = scmp.ne.s32.totalorder %s2034_s4, %s1609_s13  ;;  %p1613_p0 = scmp.lt.u32.totalorder %s1609_s13, %s2034_s4 }
0x1280   :  { %p1615_p1 = pnand %p1613_p0, %p1610_p13 }
0x1282   :  { %1618 = shalt.err (!%p1615_p1)
}
0x1283   :  { %1258 = dma.vmem_to_hbm [thread:$0]  %s1256_s7, 128, %s2034_s4, [#allocation5]  }
0x1284   :  { %s1619_s19 = scalar_lea.vmem %s1996_s9, 256  ;;  %p1624_p3 = scmp.lt.s32.totalorder %s1996_s9, %s1996_s9 }
0x1285   :  { %p1620_p2 = scmp.ne.s32.totalorder %s1996_s9, %s1619_s19  ;;  %p1625_p4 = scmp.lt.s32.totalorder %s1619_s19, %s1619_s19 }
0x1287   :  { %p1626_p5 = por %p1625_p4, %p1624_p3 }
0x1289   :  { %p1627_p6 = pnand %p1626_p5, %p1620_p2 }
0x128b   :  { %1630 = shalt.err (!%p1627_p6)
}
0x128c   :  { %s1631_s22 = scalar_lea.hbm %s2035_s5, 256 }
0x128d   :  { %p1632_p7 = scmp.ne.s32.totalorder %s2035_s5, %s1631_s22  ;;  %p1635_p8 = scmp.lt.u32.totalorder %s1631_s22, %s2035_s5 }
0x128f   :  { %p1637_p9 = pnand %p1635_p8, %p1632_p7 }
0x1291   :  { %1640 = shalt.err (!%p1637_p9)
}
0x1292   :  { %s1655_s4 = smov 128   ;;  %s1656_s27 = smov 8  }
0x1293   :  { %1270 = dma.vmem_to_hbm [thread:$0]  %s1996_s9, 256, %s2035_s5, [#allocation8], %s1655_s4, %s1655_s4, %s1656_s27  }
0x1294   :  { %1643 = dma.done.wait [#allocation5], 128  }
0x1295   :  { %1644 = vsyncadd [#allocation5], 4294967168 }
0x1296   :  { %1645 = dma.done.wait [#allocation8], 256  }
0x1297   :  { %1646 = vsyncadd [#allocation8], 4294967040 }
0x1298   :  { %1277 = vsyncpa [#allocation4], 1 }
0x1299   :  { %1278 = vsyncpa [#allocation5], 1 }
0x129a   :  { %1279 = vsyncpa [#allocation8], 1 }

</bundles_post_ra>
